<compile_context>
chip_gen: v7x
topology: tpu7x:2x2x1
jax: 0.10.0
libtpu: 0.0.40
codegen_flags: <defaults>
</compile_context>

<pallas_src>
import functools

import jax
import jax.numpy as jnp
from jax.experimental import pallas as pl
from jax.experimental.pallas import tpu as pltpu

HIDDEN = 80


def _mlp_kernel(x_ref,
                w1_ref, b1_ref, w2_ref, b2_ref, w3_ref, b3_ref,
                w4_ref, b4_ref, w5_ref, b5_ref,
                o_ref, *, layer1_on_vpu, vpu_dtype):
    """One (batch, spatial-tile) grid step of the per-pixel MLP.

    x_ref : (1, Cin, T)  input tile, channels on sublanes / pixels on lanes.
    w1_ref: (80, Cin) f32, b1_ref: (80, 1) f32            (layer 1, (C,T) orient)
    w2..w4: (80, 80) pre-transposed (in, out) bf16, b*: (1, 80) f32
    w5_ref: (Cout, 80) f32, b5_ref: (Cout, 1) f32          (layer 5, W5 @ h4^T)
    o_ref : (1, Cout, T) output tile (lane-dense store).
    """
    f32 = jnp.float32
    cdt = w2_ref.dtype          # MXU operand dtype (bf16)
    vdt = vpu_dtype             # elementwise dtype (bf16 on v6e/v7x, f32 on v5e)

    x = x_ref[0]                                          # (Cin, T) f32

    # ---- layer 1 in channels-on-sublanes orientation (lane-dense x) ----
    if layer1_on_vpu:
        # Cin is tiny (default 4): broadcast-MACs on the VPU keep the MXU free.
        cin = x.shape[0]
        w1 = w1_ref[...]                                  # (80, Cin) f32
        h = w1[:, 0:1] * x[0:1, :]
        for c in range(1, cin):
            h = h + w1[:, c:c + 1] * x[c:c + 1, :]
    else:
        # TODO(synk): for the pe/rpe configs (large Cin) this keeps the old
        # W @ X orientation on the MXU; it is one of five layers only.
        h = jnp.dot(w1_ref[...].astype(cdt), x.astype(cdt),
                    preferred_element_type=f32)
    h = jnp.maximum(h + b1_ref[...], 0.0)                 # (80, T) f32

    # Flip so the long pixel axis streams as MXU LHS rows and the 80x80
    # weights become the stationary operand (single f32 XLU transpose).
    h = jnp.transpose(h)                                  # (T, 80) f32

    # ---- layers 2-4: stationary (80, 80) weights, pixels stream as LHS ----
    h = jnp.dot(h.astype(cdt), w2_ref[...], preferred_element_type=f32)
    h = jnp.maximum(h.astype(vdt) + b2_ref[...].astype(vdt), 0.0)
    h = jnp.dot(h.astype(cdt), w3_ref[...], preferred_element_type=f32)
    h = jnp.maximum(h.astype(vdt) + b3_ref[...].astype(vdt), 0.0)
    h = jnp.dot(h.astype(cdt), w4_ref[...], preferred_element_type=f32)
    h = jnp.maximum(h + b4_ref[...], 0.0)                 # (T, 80) f32

    # ---- layer 5: W5 @ h4^T -> (Cout, T), lane-dense output store ----
    ht = jnp.transpose(h)                                 # (80, T) f32
    out = jnp.dot(w5_ref[...].astype(cdt), ht.astype(cdt),
                  preferred_element_type=f32)
    o_ref[0] = (out + b5_ref[...]).astype(o_ref.dtype)    # (Cout, T)


def _default_vpu_dtype():
    """bf16 elementwise on chips with a bf16 VPU (v6e / v7x), f32 otherwise."""
    try:
        kind = jax.devices()[0].device_kind.lower()
    except Exception:
        return jnp.float32
    if ("v6" in kind) or ("v7" in kind) or ("7x" in kind):
        return jnp.bfloat16
    return jnp.float32


@functools.partial(jax.jit,
                   static_argnames=("tile_hw", "compute_dtype", "vpu_dtype"))
def _forward(x_nchw, params, tile_hw, compute_dtype, vpu_dtype):
    n, cin, h, w = x_nchw.shape
    hw = h * w
    cout = params[-1][0].shape[0]
    f32 = jnp.float32

    # Zero-copy layout: NCHW -> (N, Cin, H*W).  No transposes in the wrapper.
    x_flat = x_nchw.reshape(n, cin, hw)

    # Spatial tile: multiple of 128 lanes, clamped to the padded extent, and
    # capped so there are >= 4 total grid steps (2 per v7x TC) when possible.
    hw_128 = pl.cdiv(hw, 128) * 128
    t_hw = max(128, (min(tile_hw, hw_128) // 128) * 128)
    min_steps = 4
    if n * pl.cdiv(hw_128, t_hw) < min_steps:
        cap = ((hw_128 * n) // min_steps // 128) * 128
        if cap >= 512:
            t_hw = min(t_hw, cap)
    hw_pad = pl.cdiv(hw, t_hw) * t_hw
    if hw_pad != hw:
        x_flat = jnp.pad(x_flat, ((0, 0), (0, 0), (0, hw_pad - hw)))

    (w1, b1), (w2, b2), (w3, b3), (w4, b4), (w5, b5) = params
    cdt = compute_dtype
    ops = [
        w1.astype(f32), b1.reshape(HIDDEN, 1).astype(f32),
        w2.T.astype(cdt), b2.reshape(1, HIDDEN).astype(f32),
        w3.T.astype(cdt), b3.reshape(1, HIDDEN).astype(f32),
        w4.T.astype(cdt), b4.reshape(1, HIDDEN).astype(f32),
        w5.astype(f32), b5.reshape(cout, 1).astype(f32),
    ]

    in_specs = [pl.BlockSpec((1, cin, t_hw), lambda ni, si: (ni, 0, si))]
    # Constant index_maps -> parameters stay resident, not re-fetched per step.
    in_specs += [pl.BlockSpec(a.shape, lambda ni, si: (0, 0)) for a in ops]

    kernel = functools.partial(_mlp_kernel,
                               layer1_on_vpu=(cin <= 16),
                               vpu_dtype=vpu_dtype)

    out = pl.pallas_call(
        kernel,
        out_shape=jax.ShapeDtypeStruct((n, cout, hw_pad), x_nchw.dtype),
        grid_spec=pltpu.PrefetchScalarGridSpec(
            num_scalar_prefetch=0,
            grid=(n, hw_pad // t_hw),
            in_specs=in_specs,
            out_specs=pl.BlockSpec((1, cout, t_hw),
                                   lambda ni, si: (ni, 0, si)),
        ),
        compiler_params=pltpu.CompilerParams(
            dimension_semantics=("parallel", "parallel"),
            vmem_limit_bytes=48 * 1024 * 1024),
    )(x_flat, *ops)

    if hw_pad != hw:
        out = out[:, :, :hw]
    # (N, Cout, H*W) -> (N, Cout, H, W): zero-copy reshape, still NCHW.
    return out.reshape(n, cout, h, w)


def fully_connected6_forward(x_nchw, params, tile_hw=4096,
                             compute_dtype=jnp.bfloat16, vpu_dtype=None):
    """Forward pass of FullyConnected6.

    x_nchw : (N, Cin, H, W) float32.
    params : list of 5 (w, b) pairs, w: (Cout_i, Cin_i), b: (Cout_i, 1)
             (the PyTorch Conv2d(cin, cout, 1) weights with the 1x1 squeezed).
    tile_hw: spatial tile width in lanes (multiple of 128).  4096 is safe on
             every generation; sweep 2048-8192 for the last few percent.
    """
    if vpu_dtype is None:
        vpu_dtype = _default_vpu_dtype()
    return _forward(x_nchw, params, tile_hw=tile_hw,
                    compute_dtype=compute_dtype, vpu_dtype=vpu_dtype)


def init_params(key, num_in, num_out=3, pe=False, r=False, rpe=False):
    """Deterministic synthetic parameters matching FullyConnected6.__init__."""
    cin = num_in + (1 if r else 0) + (21 if rpe else 0)
    dims = [cin, HIDDEN, HIDDEN, HIDDEN, HIDDEN, num_out]
    params = []
    for li in range(5):
        key, kw, kb = jax.random.split(key, 3)
        fan_in = dims[li]
        bound = 1.0 / jnp.sqrt(jnp.float32(fan_in))
        # Conv2d(cin, cout, 1) weight (cout, cin, 1, 1) -> stored as (cout, cin).
        wm = jax.random.uniform(kw, (dims[li + 1], dims[li]), jnp.float32,
                                -bound, bound)
        bm = jax.random.uniform(kb, (dims[li + 1], 1), jnp.float32,
                                -bound, bound)
        params.append((wm, bm))
    return params


def reference_forward(x_nchw, params):
    """Pure-JAX f32 reference of the 1x1-conv MLP."""
    n, cin, h, w = x_nchw.shape
    cout = params[-1][0].shape[0]
    a = x_nchw.reshape(n, cin, h * w)
    for li, (wm, bm) in enumerate(params):
        a = jnp.einsum("oc,ncs->nos", wm, a) + bm[None]
        if li < len(params) - 1:
            a = jnp.maximum(a, 0.0)
    return a.reshape(n, cout, h, w)


if __name__ == "__main__":
    key = jax.random.PRNGKey(0)
    key, kx, kp = jax.random.split(key, 3)

    num_in, num_out = 4, 3
    N, H, W = 2, 16, 16
    x = jax.random.normal(kx, (N, num_in, H, W), jnp.float32)

    params = init_params(kp, num_in, num_out)

    out = fully_connected6_forward(x, params)
    out = jax.block_until_ready(out)

    ref = reference_forward(x, params)
    assert out.shape == (N, num_out, H, W), out.shape
    # bf16 MXU operands with f32 accumulation -> loosened tolerance vs f32 ref.
    max_err = float(jnp.max(jnp.abs(out - ref)))
    assert jnp.allclose(out, ref, atol=5e-2, rtol=5e-2), (
        f"mismatch vs reference (max abs err {max_err})")

    print("KERNEL_OK")
</pallas_src>

<mosaic_0001>
module attributes {stable_mosaic.version = 11 : i64} {
  func.func @_mlp_kernel(%arg0: i32, %arg1: i32, %arg2: memref<1x4x256xf32, #tpu.memory_space<vmem>>, %arg3: memref<80x4xf32, #tpu.memory_space<vmem>>, %arg4: memref<80x1xf32, #tpu.memory_space<vmem>>, %arg5: memref<80x80xbf16, #tpu.memory_space<vmem>>, %arg6: memref<1x80xf32, #tpu.memory_space<vmem>>, %arg7: memref<80x80xbf16, #tpu.memory_space<vmem>>, %arg8: memref<1x80xf32, #tpu.memory_space<vmem>>, %arg9: memref<80x80xbf16, #tpu.memory_space<vmem>>, %arg10: memref<1x80xf32, #tpu.memory_space<vmem>>, %arg11: memref<3x80xf32, #tpu.memory_space<vmem>>, %arg12: memref<3x1xf32, #tpu.memory_space<vmem>>, %arg13: memref<1x3x256xf32, #tpu.memory_space<vmem>>) attributes {dimension_semantics = [#tpu.dimension_semantics<parallel>, #tpu.dimension_semantics<parallel>], iteration_bounds = array<i64: 2, 1>, scalar_prefetch = 0 : i64, scratch_operands = 0 : i64, tpu.core_type = #tpu.core_type<tc>, window_params = [{transform_indices = @transform_0, window_bounds = array<i64: 1, 4, 256>}, {pipeline_mode = #tpu.pipeline_mode<synchronous>, transform_indices = @transform_1, window_bounds = array<i64: 80, 4>}, {pipeline_mode = #tpu.pipeline_mode<synchronous>, transform_indices = @transform_2, window_bounds = array<i64: 80, 1>}, {pipeline_mode = #tpu.pipeline_mode<synchronous>, transform_indices = @transform_3, window_bounds = array<i64: 80, 80>}, {pipeline_mode = #tpu.pipeline_mode<synchronous>, transform_indices = @transform_4, window_bounds = array<i64: 1, 80>}, {pipeline_mode = #tpu.pipeline_mode<synchronous>, transform_indices = @transform_5, window_bounds = array<i64: 80, 80>}, {pipeline_mode = #tpu.pipeline_mode<synchronous>, transform_indices = @transform_6, window_bounds = array<i64: 1, 80>}, {pipeline_mode = #tpu.pipeline_mode<synchronous>, transform_indices = @transform_7, window_bounds = array<i64: 80, 80>}, {pipeline_mode = #tpu.pipeline_mode<synchronous>, transform_indices = @transform_8, window_bounds = array<i64: 1, 80>}, {pipeline_mode = #tpu.pipeline_mode<synchronous>, transform_indices = @transform_9, window_bounds = array<i64: 3, 80>}, {pipeline_mode = #tpu.pipeline_mode<synchronous>, transform_indices = @transform_10, window_bounds = array<i64: 3, 1>}, {transform_indices = @transform_11, window_bounds = array<i64: 1, 3, 256>}]} {
    %c0 = arith.constant 0 : index
    %c0_0 = arith.constant 0 : index
    %c0_1 = arith.constant 0 : index
    %0 = vector.load %arg2[%c0, %c0_0, %c0_1] : memref<1x4x256xf32, #tpu.memory_space<vmem>>, vector<1x4x256xf32>
    %1 = vector.shape_cast %0 : vector<1x4x256xf32> to vector<4x256xf32>
    %c0_2 = arith.constant 0 : index
    %c0_3 = arith.constant 0 : index
    %2 = vector.load %arg3[%c0_2, %c0_3] : memref<80x4xf32, #tpu.memory_space<vmem>>, vector<80x4xf32>
    %3 = vector.extract_strided_slice %2 {offsets = [0, 0], sizes = [80, 1], strides = [1, 1]} : vector<80x4xf32> to vector<80x1xf32>
    %4 = vector.extract_strided_slice %1 {offsets = [0, 0], sizes = [1, 256], strides = [1, 1]} : vector<4x256xf32> to vector<1x256xf32>
    %5 = vector.broadcast %3 : vector<80x1xf32> to vector<80x256xf32>
    %6 = vector.broadcast %4 : vector<1x256xf32> to vector<80x256xf32>
    %7 = arith.mulf %5, %6 : vector<80x256xf32>
    %8 = vector.extract_strided_slice %2 {offsets = [0, 1], sizes = [80, 1], strides = [1, 1]} : vector<80x4xf32> to vector<80x1xf32>
    %9 = vector.extract_strided_slice %1 {offsets = [1, 0], sizes = [1, 256], strides = [1, 1]} : vector<4x256xf32> to vector<1x256xf32>
    %10 = vector.broadcast %8 : vector<80x1xf32> to vector<80x256xf32>
    %11 = vector.broadcast %9 : vector<1x256xf32> to vector<80x256xf32>
    %12 = arith.mulf %10, %11 : vector<80x256xf32>
    %13 = arith.addf %7, %12 : vector<80x256xf32>
    %14 = vector.extract_strided_slice %2 {offsets = [0, 2], sizes = [80, 1], strides = [1, 1]} : vector<80x4xf32> to vector<80x1xf32>
    %15 = vector.extract_strided_slice %1 {offsets = [2, 0], sizes = [1, 256], strides = [1, 1]} : vector<4x256xf32> to vector<1x256xf32>
    %16 = vector.broadcast %14 : vector<80x1xf32> to vector<80x256xf32>
    %17 = vector.broadcast %15 : vector<1x256xf32> to vector<80x256xf32>
    %18 = arith.mulf %16, %17 : vector<80x256xf32>
    %19 = arith.addf %13, %18 : vector<80x256xf32>
    %20 = vector.extract_strided_slice %2 {offsets = [0, 3], sizes = [80, 1], strides = [1, 1]} : vector<80x4xf32> to vector<80x1xf32>
    %21 = vector.extract_strided_slice %1 {offsets = [3, 0], sizes = [1, 256], strides = [1, 1]} : vector<4x256xf32> to vector<1x256xf32>
    %22 = vector.broadcast %20 : vector<80x1xf32> to vector<80x256xf32>
    %23 = vector.broadcast %21 : vector<1x256xf32> to vector<80x256xf32>
    %24 = arith.mulf %22, %23 : vector<80x256xf32>
    %25 = arith.addf %19, %24 : vector<80x256xf32>
    %c0_4 = arith.constant 0 : index
    %c0_5 = arith.constant 0 : index
    %26 = vector.load %arg4[%c0_4, %c0_5] : memref<80x1xf32, #tpu.memory_space<vmem>>, vector<80x1xf32>
    %27 = vector.broadcast %26 : vector<80x1xf32> to vector<80x256xf32>
    %28 = arith.addf %25, %27 : vector<80x256xf32>
    %cst = arith.constant 0.000000e+00 : f32
    %29 = vector.broadcast %cst : f32 to vector<80x256xf32>
    %30 = arith.maximumf %28, %29 : vector<80x256xf32>
    %31 = tpu.transpose %30, [1, 0] : vector<80x256xf32> -> vector<256x80xf32>
    %32 = arith.truncf %31 : vector<256x80xf32> to vector<256x80xbf16>
    %c0_6 = arith.constant 0 : index
    %c0_7 = arith.constant 0 : index
    %33 = vector.load %arg5[%c0_6, %c0_7] : memref<80x80xbf16, #tpu.memory_space<vmem>>, vector<80x80xbf16>
    %cst_8 = arith.constant dense<0.000000e+00> : vector<256x80xf32>
    %34 = tpu.matmul %32, %33, %cst_8 {dimension_numbers = #tpu.dot_dimension_numbers<[1], [0], [0], [1], [0, 0, 1, 1], [], []>} : vector<256x80xbf16>, vector<80x80xbf16>, vector<256x80xf32> -> vector<256x80xf32>
    %c0_9 = arith.constant 0 : index
    %c0_10 = arith.constant 0 : index
    %35 = vector.load %arg6[%c0_9, %c0_10] : memref<1x80xf32, #tpu.memory_space<vmem>>, vector<1x80xf32>
    %36 = vector.broadcast %35 : vector<1x80xf32> to vector<256x80xf32>
    %37 = arith.addf %34, %36 : vector<256x80xf32>
    %cst_11 = arith.constant 0.000000e+00 : f32
    %38 = vector.broadcast %cst_11 : f32 to vector<256x80xf32>
    %39 = arith.maximumf %37, %38 : vector<256x80xf32>
    %40 = arith.truncf %39 : vector<256x80xf32> to vector<256x80xbf16>
    %c0_12 = arith.constant 0 : index
    %c0_13 = arith.constant 0 : index
    %41 = vector.load %arg7[%c0_12, %c0_13] : memref<80x80xbf16, #tpu.memory_space<vmem>>, vector<80x80xbf16>
    %cst_14 = arith.constant dense<0.000000e+00> : vector<256x80xf32>
    %42 = tpu.matmul %40, %41, %cst_14 {dimension_numbers = #tpu.dot_dimension_numbers<[1], [0], [0], [1], [0, 0, 1, 1], [], []>} : vector<256x80xbf16>, vector<80x80xbf16>, vector<256x80xf32> -> vector<256x80xf32>
    %c0_15 = arith.constant 0 : index
    %c0_16 = arith.constant 0 : index
    %43 = vector.load %arg8[%c0_15, %c0_16] : memref<1x80xf32, #tpu.memory_space<vmem>>, vector<1x80xf32>
    %44 = vector.broadcast %43 : vector<1x80xf32> to vector<256x80xf32>
    %45 = arith.addf %42, %44 : vector<256x80xf32>
    %cst_17 = arith.constant 0.000000e+00 : f32
    %46 = vector.broadcast %cst_17 : f32 to vector<256x80xf32>
    %47 = arith.maximumf %45, %46 : vector<256x80xf32>
    %48 = arith.truncf %47 : vector<256x80xf32> to vector<256x80xbf16>
    %c0_18 = arith.constant 0 : index
    %c0_19 = arith.constant 0 : index
    %49 = vector.load %arg9[%c0_18, %c0_19] : memref<80x80xbf16, #tpu.memory_space<vmem>>, vector<80x80xbf16>
    %cst_20 = arith.constant dense<0.000000e+00> : vector<256x80xf32>
    %50 = tpu.matmul %48, %49, %cst_20 {dimension_numbers = #tpu.dot_dimension_numbers<[1], [0], [0], [1], [0, 0, 1, 1], [], []>} : vector<256x80xbf16>, vector<80x80xbf16>, vector<256x80xf32> -> vector<256x80xf32>
    %c0_21 = arith.constant 0 : index
    %c0_22 = arith.constant 0 : index
    %51 = vector.load %arg10[%c0_21, %c0_22] : memref<1x80xf32, #tpu.memory_space<vmem>>, vector<1x80xf32>
    %52 = vector.broadcast %51 : vector<1x80xf32> to vector<256x80xf32>
    %53 = arith.addf %50, %52 : vector<256x80xf32>
    %cst_23 = arith.constant 0.000000e+00 : f32
    %54 = vector.broadcast %cst_23 : f32 to vector<256x80xf32>
    %55 = arith.maximumf %53, %54 : vector<256x80xf32>
    %56 = tpu.transpose %55, [1, 0] : vector<256x80xf32> -> vector<80x256xf32>
    %c0_24 = arith.constant 0 : index
    %c0_25 = arith.constant 0 : index
    %57 = vector.load %arg11[%c0_24, %c0_25] : memref<3x80xf32, #tpu.memory_space<vmem>>, vector<3x80xf32>
    %58 = arith.truncf %57 : vector<3x80xf32> to vector<3x80xbf16>
    %59 = arith.truncf %56 : vector<80x256xf32> to vector<80x256xbf16>
    %cst_26 = arith.constant dense<0.000000e+00> : vector<3x256xf32>
    %60 = tpu.matmul %58, %59, %cst_26 {dimension_numbers = #tpu.dot_dimension_numbers<[1], [0], [0], [1], [0, 0, 1, 1], [], []>} : vector<3x80xbf16>, vector<80x256xbf16>, vector<3x256xf32> -> vector<3x256xf32>
    %c0_27 = arith.constant 0 : index
    %c0_28 = arith.constant 0 : index
    %61 = vector.load %arg12[%c0_27, %c0_28] : memref<3x1xf32, #tpu.memory_space<vmem>>, vector<3x1xf32>
    %62 = vector.broadcast %61 : vector<3x1xf32> to vector<3x256xf32>
    %63 = arith.addf %60, %62 : vector<3x256xf32>
    %c0_29 = arith.constant 0 : index
    %c0_30 = arith.constant 0 : index
    %c0_31 = arith.constant 0 : index
    %64 = vector.load %arg13[%c0_29, %c0_30, %c0_31] : memref<1x3x256xf32, #tpu.memory_space<vmem>>, vector<1x3x256xf32>
    %65 = vector.shape_cast %64 : vector<1x3x256xf32> to vector<3x256xf32>
    %66 = vector.shape_cast %63 : vector<3x256xf32> to vector<1x3x256xf32>
    tpu.vector_store %arg13[%c0_29, %c0_30, %c0_31], %66 {strides = array<i32>} : memref<1x3x256xf32, #tpu.memory_space<vmem>>, vector<1x3x256xf32>,
    return
  }
  func.func @transform_0(%arg0: i32, %arg1: i32) -> (i32, i32, i32) {
    %c0_i32 = arith.constant 0 : i32
    %c0_i32_0 = arith.constant 0 : i32
    return %arg0, %c0_i32, %arg1 : i32, i32, i32
  }
  func.func @transform_1(%arg0: i32, %arg1: i32) -> (i32, i32) {
    %c0_i32 = arith.constant 0 : i32
    %c0_i32_0 = arith.constant 0 : i32
    %c0_i32_1 = arith.constant 0 : i32
    return %c0_i32, %c0_i32_0 : i32, i32
  }
  func.func @transform_2(%arg0: i32, %arg1: i32) -> (i32, i32) {
    %c0_i32 = arith.constant 0 : i32
    %c0_i32_0 = arith.constant 0 : i32
    %c0_i32_1 = arith.constant 0 : i32
    return %c0_i32, %c0_i32_0 : i32, i32
  }
  func.func @transform_3(%arg0: i32, %arg1: i32) -> (i32, i32) {
    %c0_i32 = arith.constant 0 : i32
    %c0_i32_0 = arith.constant 0 : i32
    %c0_i32_1 = arith.constant 0 : i32
    return %c0_i32, %c0_i32_0 : i32, i32
  }
  func.func @transform_4(%arg0: i32, %arg1: i32) -> (i32, i32) {
    %c0_i32 = arith.constant 0 : i32
    %c0_i32_0 = arith.constant 0 : i32
    %c0_i32_1 = arith.constant 0 : i32
    return %c0_i32, %c0_i32_0 : i32, i32
  }
  func.func @transform_5(%arg0: i32, %arg1: i32) -> (i32, i32) {
    %c0_i32 = arith.constant 0 : i32
    %c0_i32_0 = arith.constant 0 : i32
    %c0_i32_1 = arith.constant 0 : i32
    return %c0_i32, %c0_i32_0 : i32, i32
  }
  func.func @transform_6(%arg0: i32, %arg1: i32) -> (i32, i32) {
    %c0_i32 = arith.constant 0 : i32
    %c0_i32_0 = arith.constant 0 : i32
    %c0_i32_1 = arith.constant 0 : i32
    return %c0_i32, %c0_i32_0 : i32, i32
  }
  func.func @transform_7(%arg0: i32, %arg1: i32) -> (i32, i32) {
    %c0_i32 = arith.constant 0 : i32
    %c0_i32_0 = arith.constant 0 : i32
    %c0_i32_1 = arith.constant 0 : i32
    return %c0_i32, %c0_i32_0 : i32, i32
  }
  func.func @transform_8(%arg0: i32, %arg1: i32) -> (i32, i32) {
    %c0_i32 = arith.constant 0 : i32
    %c0_i32_0 = arith.constant 0 : i32
    %c0_i32_1 = arith.constant 0 : i32
    return %c0_i32, %c0_i32_0 : i32, i32
  }
  func.func @transform_9(%arg0: i32, %arg1: i32) -> (i32, i32) {
    %c0_i32 = arith.constant 0 : i32
    %c0_i32_0 = arith.constant 0 : i32
    %c0_i32_1 = arith.constant 0 : i32
    return %c0_i32, %c0_i32_0 : i32, i32
  }
  func.func @transform_10(%arg0: i32, %arg1: i32) -> (i32, i32) {
    %c0_i32 = arith.constant 0 : i32
    %c0_i32_0 = arith.constant 0 : i32
    %c0_i32_1 = arith.constant 0 : i32
    return %c0_i32, %c0_i32_0 : i32, i32
  }
  func.func @transform_11(%arg0: i32, %arg1: i32) -> (i32, i32, i32) {
    %c0_i32 = arith.constant 0 : i32
    %c0_i32_0 = arith.constant 0 : i32
    return %arg0, %c0_i32, %arg1 : i32, i32, i32
  }
}

</mosaic_0001>

<bundles_post_ra>
// kernel: _forward.1
= control target key start
LH: loop header
LB: loop body
LE: loop exit
PB: predicated region body
PF: predicated region fallthrough
CT: control target
= control target key end

     0   :  { %s2643_s17 = smov 0   ;;  %s2645_s18 = smov 0   ;;  %s3217_s0 = inlined_call_operand.vmem [shape: f32[2,4,256], index: 0, kind: input, shape index: {}]   ;;  %s3218_s1 = inlined_call_operand.vmem [shape: f32[80,4], index: 1, kind: input, shape index: {}]   ;;  %s3219_s2 = inlined_call_operand.vmem [shape: f32[80,1], index: 2, kind: input, shape index: {}]   ;;  %s3220_s3 = inlined_call_operand.vmem [shape: bf16[80,80], index: 3, kind: input, shape index: {}]   ;;  %s3221_s4 = inlined_call_operand.vmem [shape: f32[1,80], index: 4, kind: input, shape index: {}]   ;;  %s3222_s5 = inlined_call_operand.vmem [shape: bf16[80,80], index: 5, kind: input, shape index: {}]   ;;  %s3223_s6 = inlined_call_operand.vmem [shape: f32[1,80], index: 6, kind: input, shape index: {}]   ;;  %s3224_s7 = inlined_call_operand.vmem [shape: bf16[80,80], index: 7, kind: input, shape index: {}]   ;;  %s3225_s8 = inlined_call_operand.vmem [shape: f32[1,80], index: 8, kind: input, shape index: {}]   ;;  %s3226_s9 = inlined_call_operand.vmem [shape: f32[3,80], index: 9, kind: input, shape index: {}]   ;;  %s3227_s10 = inlined_call_operand.vmem [shape: f32[3,1], index: 10, kind: input, shape index: {}]   ;;  %s3228_s11 = inlined_call_operand.vmem [shape: f32[2,3,256], index: 11, kind: output, shape index: {}]  }
   0x1   :  { %s2647_s19 = smov 0  }
   0x2 LB: > { %s33_s20 = sadd.s32 1, %s2573_s18  ;;  %p2120_p0 = scmp.ge.s32.totalorder %s2577_s19, 1  ;;  %s2577_s19 = sphi %s2647_s19, %s21_s19   ;;  %s2573_s18 = sphi %s2645_s18, %s3230_s18   ;;  %s2569_s17 = sphi %s2643_s17, %s3229_s17  }
   0x3   : > { %p35_p1 = scmp.ge.s32.totalorder %s33_s20, 2  ;;  %p358_p2 = scmp.lt.s32.totalorder %s2577_s19, 3 }
   0x5   : > { %s3232_s20 = smov (%p35_p1, %s33_s20), 0  ;;  %p359_p3 = pnand %p2120_p0, %p358_p2 }
   0x6   : > { %v429_v0 = vld [vmem:[%s3218_s1 + $0x8] sm:$0xff] (!%p359_p3)  ;;  %v428_v1 = vld [vmem:[%s3218_s1] sm:$0xff] (!%p359_p3)  ;;  %v2579_v2 = vmov (!%p359_p3), 1   ;;  %v2580_v3 = vmov (!%p359_p3), 0   ;;  %v2678_v5 = vld [vmem:[%s3218_s1 + $0x38] sm:$0xff] (!%p359_p3)  ;;  %v2581_v7 = vmov (!%p359_p3), 2   ;;  %v489_v34 = vlaneseq (!%p359_p3) }
   0x7   : > { %362 = sbr.rel (%p359_p3) target bundleno = 1513 (0x5e9), region = 64  ;;  %2424 = vset.pattern.permute.xlu0 (!%p359_p3), %v2579_v2  ;;  %2425 = vset.pattern.permute.xlu1 (!%p359_p3), %v2580_v3  ;;  %v432_v4 = vld [vmem:[%s3218_s1 + $0x20] sm:$0xff] (!%p359_p3)  ;;  %v430_v6 = vld [vmem:[%s3218_s1 + $0x10] sm:$0xff] (!%p359_p3)  ;;  %v431_v8 = vld [vmem:[%s3218_s1 + $0x18] sm:$0xff] (!%p359_p3)  ;;  %v2582_v10 = vmov (!%p359_p3), 3   ;;  %p407_p4 = scmp.lt.s32.totalorder (!%p359_p3), %s2569_s17, 1 }
   0x8   : > { %445 = vperm.xlu1 (!%p359_p3), %2425, %v429_v0   ;;  %528 = vperm.xlu0 (!%p359_p3), %2424, %v428_v1   ;;  %v821_v9 = vld [vmem:[%s3219_s2] sm:$0xff] (!%p359_p3)  ;;  %v434_v11 = vld [vmem:[%s3218_s1 + $0x30] sm:$0xff] (!%p359_p3)  ;;  %v824_v12 = vld [vmem:[%s3219_s2 + $0x18] sm:$0xff] (!%p359_p3)  ;;  %v490_v37 = vshrl.u32 (!%p359_p3), %v489_v34, 7  ;;  %vm1048_vm0 = vcmask (!%p359_p3), 654336  }
   0x9   : > { %v437_v13 = vld [vmem:[%s3218_s1 + $0x48] sm:$0xff] (!%p359_p3)  ;;  %v436_v15 = vld [vmem:[%s3218_s1 + $0x40] sm:$0xff] (!%p359_p3)  ;;  %v823_v18 = vld [vmem:[%s3219_s2 + $0x10] sm:$0xff] (!%p359_p3) }
   0xa   : > { %v433_v14 = vld [vmem:[%s3218_s1 + $0x28] sm:$0xff] (!%p359_p3)  ;;  %v829_v17 = vld [vmem:[%s3219_s2 + $0x40] sm:$0xff] (!%p359_p3)  ;;  %v827_v28 = vld [vmem:[%s3219_s2 + $0x30] sm:$0xff] (!%p359_p3)  ;;  %v569_v39 = vsub.s32 (!%p359_p3), 1, %v490_v37  ;;  %v573_v40 = vsub.s32 (!%p359_p3), 5, %v490_v37  ;;  %v491_v41 = vsub.s32 (!%p359_p3), 0, %v490_v37 }
   0xb   : > { %v822_v16 = vld [vmem:[%s3219_s2 + $0x8] sm:$0xff] (!%p359_p3)  ;;  %v825_v19 = vld [vmem:[%s3219_s2 + $0x20] sm:$0xff] (!%p359_p3)  ;;  %v828_v31 = vld [vmem:[%s3219_s2 + $0x38] sm:$0xff] (!%p359_p3)  ;;  %v495_v42 = vsub.s32 (!%p359_p3), 4, %v490_v37  ;;  %v667_v46 = vsub.s32 (!%p359_p3), 2, %v490_v37  ;;  %v671_v47 = vsub.s32 (!%p359_p3), 6, %v490_v37 }
   0xc   : > { %2426 = vset.pattern.permute.xlu1 (!%p359_p3), %v2579_v2  ;;  %544 = vperm.xlu0 (!%p359_p3), %2424, %v432_v4   ;;  %v826_v23 = vld [vmem:[%s3219_s2 + $0x28] sm:$0xff] (!%p359_p3) }
   0xd   : > { %532 = vperm.xlu1 (!%p359_p3), %2426, %v429_v0   ;;  %v830_v35 = vld [vmem:[%s3219_s2 + $0x48] sm:$0xff] (!%p359_p3) }
   0xe   : > { %s3234_s17 = smov (!%p407_p4, %s2569_s17), 1 }
   0xf   : > { %s2194_s12 = sshll.u32 %s3234_s17, 3 }
  0x10   : > { %556 = vperm.xlu0 %2424, %v2678_v5   ;;  %s414_s15 = scalar_lea.vmem %s3217_s0, %s2194_s12  ;;  %s424_s16 = scalar_lea.vmem %s3228_s11, %s2194_s12 }
  0x11   : > { %2427 = vset.pattern.permute.xlu1 %v2581_v7  ;;  %v427_v45 = vld [vmem:[%s414_s15] sm:$0xff] }
  0x12   : > { %626 = vperm.xlu1 %2427, %v428_v1   ;;  %v570_v48 = vrot.slane %v427_v45, %v569_v39  ;;  %v574_v49 = vrot.slane %v427_v45, %v573_v40  ;;  %v492_v50 = vrot.slane %v427_v45, %v491_v41  ;;  %v496_v51 = vrot.slane %v427_v45, %v495_v42 }
  0x13   : > { %v668_v53 = vrot.slane %v427_v45, %v667_v46  ;;  %v672_v54 = vrot.slane %v427_v45, %v671_v47 }
  0x14   : > { %2443 = vset.pattern.permute.xlu0 %v2581_v7  ;;  %v2793_v56 = vrot.slane %v570_v48, %v569_v39  ;;  %v2795_v57 = vrot.slane %v574_v49, %v569_v39  ;;  %v2797_v58 = vrot.slane %v492_v50, %v491_v41  ;;  %v2799_v59 = vrot.slane %v496_v51, %v491_v41 }
  0x15   : > { %634 = vperm.xlu0 %2443, %v430_v6   ;;  %v2805_v63 = vrot.slane %v668_v53, %v667_v46 }
  0x16   : > { %2428 = vset.pattern.permute.xlu1 %v2579_v2 }
  0x17   : > { %536 = vperm.xlu1 %2428, %v430_v6  }
  0x19   : > { %642 = vperm.xlu0 %2443, %v432_v4  }
  0x1b   : > { %2429 = vset.pattern.permute.xlu1 %v2581_v7 }
  0x1c   : > { %630 = vperm.xlu1 %2429, %v429_v0  }
  0x1d   : > { %654 = vperm.xlu0 %2443, %v2678_v5  }
  0x20   : > { %2430 = vset.pattern.permute.xlu1 %v2580_v3 }
  0x21   : > { %455 = vperm.xlu1 %2430, %v431_v8   ;;  %2448 = vset.pattern.permute.xlu0 %v2580_v3 }
  0x22   : > { %440 = vperm.xlu0 %2448, %v428_v1  }
  0x25   : > { %2431 = vset.pattern.permute.xlu1 %v2579_v2 }
  0x26   : > { %540 = vperm.xlu1 %2431, %v431_v8   ;;  %450 = vperm.xlu0 %2448, %v430_v6  }
  0x2a   : > { %2432 = vset.pattern.permute.xlu1 %v2582_v10  ;;  %833 = vperm.xlu0 %2448, %v821_v9  }
  0x2b   : > { %728 = vperm.xlu1 %2432, %v429_v0   ;;  %v2807_v0 = vrot.slane %v672_v54, %v667_v46 }
  0x2e   : > { %470 = vperm.xlu0 %2448, %v434_v11  }
  0x2f   : > { %2433 = vset.pattern.permute.xlu1 %v2580_v3 }
  0x30   : > { %460 = vperm.xlu1 %2433, %v432_v4  }
  0x32   : > { %848 = vperm.xlu0 %2448, %v824_v12  }
  0x34   : > { %2434 = vset.pattern.permute.xlu1 %v2581_v7 }
  0x35   : > { %638 = vperm.xlu1 %2434, %v431_v8  }
  0x36   : > { %485 = vperm.xlu0 %2448, %v437_v13  }
  0x39   : > { %2435 = vset.pattern.permute.xlu1 %v2582_v10 }
  0x3a   : > { %732 = vperm.xlu1 %2435, %v430_v6   ;;  %2451 = vset.pattern.permute.xlu0 %v2582_v10 }
  0x3b   : > { %724 = vperm.xlu0 %2451, %v428_v1  }
  0x3e   : > { %2436 = vset.pattern.permute.xlu1 %v2580_v3 }
  0x3f   : > { %465 = vperm.xlu1 %2436, %v433_v14   ;;  %740 = vperm.xlu0 %2451, %v432_v4  }
  0x43   : > { %2437 = vset.pattern.permute.xlu1 %v2579_v2  ;;  %752 = vperm.xlu0 %2451, %v2678_v5  }
  0x44   : > { %548 = vperm.xlu1 %2437, %v433_v14  }
  0x47   : > { %756 = vperm.xlu0 %2451, %v436_v15  }
  0x48   : > { %2438 = vset.pattern.permute.xlu1 %v2582_v10 }
  0x49   : > { %736 = vperm.xlu1 %2438, %v431_v8   ;;  %v769_v8 = vsub.s32 7, %v490_v37 }
  0x4b   : > { %760 = vperm.xlu0 %2451, %v437_v13  }
  0x4d   : > { %2439 = vset.pattern.permute.xlu1 %v2580_v3 }
  0x4e   : > { %838 = vperm.xlu1 %2439, %v822_v16  }
  0x4f   : > { %2457 = vset.pattern.permute.xlu0 %v2580_v3 }
  0x50   : > { %873 = vperm.xlu0 %2457, %v829_v17  }
  0x52   : > { %2440 = vset.pattern.permute.xlu1 %v2579_v2 }
  0x53   : > { %552 = vperm.xlu1 %2440, %v434_v11  }
  0x57   : > { %2441 = vset.pattern.permute.xlu1 %v2581_v7 }
  0x58   : > { %646 = vperm.xlu1 %2441, %v433_v14  }
  0x5c   : > { %2442 = vset.pattern.permute.xlu1 %v2580_v3 }
  0x5d   : > { %843 = vperm.xlu1 %2442, %v823_v18  }
  0x61   : > { %475 = vperm.xlu1 %2442, %v2678_v5  }
  0x65   : > { %2444 = vset.pattern.permute.xlu1 %v2581_v7 }
  0x66   : > { %650 = vperm.xlu1 %2444, %v434_v11  }
  0x6a   : > { %2445 = vset.pattern.permute.xlu1 %v2582_v10 }
  0x6b   : > { %744 = vperm.xlu1 %2445, %v433_v14  }
  0x6f   : > { %2446 = vset.pattern.permute.xlu1 %v2580_v3 }
  0x70   : > { %480 = vperm.xlu1 %2446, %v436_v15  }
  0x74   : > { %2447 = vset.pattern.permute.xlu1 %v2579_v2 }
  0x75   : > { %560 = vperm.xlu1 %2447, %v436_v15  }
  0x79   : > { %2449 = vset.pattern.permute.xlu1 %v2582_v10 }
  0x7a   : > { %748 = vperm.xlu1 %2449, %v434_v11  }
  0x7e   : > { %2450 = vset.pattern.permute.xlu1 %v2580_v3 }
  0x7f   : > { %853 = vperm.xlu1 %2450, %v825_v19  }
  0x83   : > { %2452 = vset.pattern.permute.xlu1 %v2579_v2 }
  0x84   : > { %564 = vperm.xlu1 %2452, %v437_v13  }
  0x87   : > { %v2741_v20 = vpop.permute.xlu1 %445  ;;  %v2743_v21 = vpop.permute.xlu0 %528 }
  0x88   : > { %2453 = vset.pattern.permute.xlu1 %v2581_v7  ;;  %v586_v12 = vmul.f32 %v2795_v57, %v2743_v21  ;;  %v585_v17 = vmul.f32 %v2793_v56, %v2743_v21 }
  0x89   : > { %658 = vperm.xlu1 %2453, %v436_v15  }
  0x8b   : > { %v545_v22 = vpop.permute.xlu0 %544 }
  0x8c   : > { %v2749_v24 = vpop.permute.xlu1 %532  ;;  %v593_v61 = vmul.f32 %v2793_v56, %v545_v22  ;;  %v594_v62 = vmul.f32 %v2795_v57, %v545_v22  ;;  %v770_v22 = vrot.slane %v427_v45, %v769_v8 }
  0x8d   : > { %2454 = vset.pattern.permute.xlu1 %v2580_v3  ;;  %v587_v50 = vmul.f32 %v2793_v56, %v2749_v24  ;;  %v588_v51 = vmul.f32 %v2795_v57, %v2749_v24 }
  0x8e   : > { %858 = vperm.xlu1 %2454, %v826_v23  }
  0x8f   : > { %v2752_v25 = vpop.permute.xlu0 %556 }
  0x91   : > { %v2754_v26 = vpop.permute.xlu1 %626 }
  0x92   : > { %2455 = vset.pattern.permute.xlu1 %v2581_v7  ;;  %v765_v7 = vsub.s32 3, %v490_v37  ;;  %v683_v21 = vmul.f32 %v2805_v63, %v2754_v26 }
  0x93   : > { %662 = vperm.xlu1 %2455, %v437_v13  }
  0x94   : > { %v2757_v27 = vpop.permute.xlu0 %634  ;;  %v766_v19 = vrot.slane %v427_v45, %v765_v7 }
  0x96   : > { %v2762_v29 = vpop.permute.xlu1 %536  ;;  %v2831_v34 = vrot.slane %v766_v19, %v765_v7 }
  0x97   : > { %2456 = vset.pattern.permute.xlu1 %v2580_v3 }
  0x98   : > { %863 = vperm.xlu1 %2456, %v827_v28   ;;  %v643_v30 = vpop.permute.xlu0 %642 }
  0x99   : > { %v691_v2 = vmul.f32 %v2805_v63, %v643_v30  ;;  %v692_v4 = vmul.f32 %v2807_v0, %v643_v30  ;;  %v684_v30 = vmul.f32 %v2807_v0, %v2754_v26 }
  0x9b   : > { %v2769_v32 = vpop.permute.xlu1 %630 }
  0x9c   : > { %868 = vperm.xlu1 %2456, %v828_v31   ;;  %v2774_v33 = vpop.permute.xlu0 %654  ;;  %v685_v24 = vmul.f32 %v2805_v63, %v2769_v32 }
  0xa0   : > { %878 = vperm.xlu1 %2456, %v830_v35   ;;  %v2780_v36 = vpop.permute.xlu1 %455  ;;  %v2833_v35 = vrot.slane %v770_v22, %v765_v7 }
  0xa1   : > { %v441_v38 = vpop.permute.xlu0 %440 }
  0xa2   : > { %v508_v13 = vmul.f32 %v2799_v59, %v441_v38  ;;  %v507_v18 = vmul.f32 %v2797_v58, %v441_v38 }
  0xa4   : > { %v606_v28 = vadd.f32 %v586_v12, %v508_v13  ;;  %v605_v31 = vadd.f32 %v585_v17, %v507_v18 }
  0xa5   : > { %v2787_v43 = vpop.permute.xlu1 %540  ;;  %v2789_v44 = vpop.permute.xlu0 %450 }
  0xa6   : > { %v704_v38 = vadd.f32 %v684_v30, %v606_v28  ;;  %v703_v42 = vadd.f32 %v683_v21, %v605_v31  ;;  %v512_v21 = vmul.f32 %v2799_v59, %v2789_v44 }
  0xa9   : > { %v834_v52 = vpop.permute.xlu0 %833 }
  0xaa   : > { %v2791_v55 = vpop.permute.xlu1 %728 }
  0xab   : > { %v784_v12 = vmul.f32 %v2833_v35, %v2791_v55 }
  0xad   : > { %v2801_v60 = vpop.permute.xlu0 %470 }
  0xaf   : > { %v461_v1 = vpop.permute.xlu1 %460 }
  0xb0   : > { %v515_v5 = vmul.f32 %v2797_v58, %v461_v1  ;;  %v516_v6 = vmul.f32 %v2799_v59, %v461_v1 }
  0xb1   : > { %v2813_v9 = vpop.permute.xlu0 %848 }
  0xb2   : > { %v613_v10 = vadd.f32 %v593_v61, %v515_v5  ;;  %v614_v11 = vadd.f32 %v594_v62, %v516_v6 }
  0xb4   : > { %v2818_v14 = vpop.permute.xlu1 %638  ;;  %v2820_v15 = vadd.f32 %v691_v2, %v613_v10  ;;  %v2822_v16 = vadd.f32 %v692_v4, %v614_v11  ;;  %v509_v2 = vmul.f32 %v2797_v58, %v2741_v20  ;;  %v510_v4 = vmul.f32 %v2799_v59, %v2741_v20 }
  0xb5   : > { %v2827_v23 = vpop.permute.xlu0 %485  ;;  %v783_v11 = vmul.f32 %v2831_v34, %v2791_v55  ;;  %v591_v55 = vmul.f32 %v2793_v56, %v2787_v43 }
  0xb6   : > { %v607_v8 = vadd.f32 %v587_v50, %v509_v2  ;;  %v608_v10 = vadd.f32 %v588_v51, %v510_v4 }
  0xb8   : > { %v705_v13 = vadd.f32 %v685_v24, %v607_v8 }
  0xb9   : > { %v2835_v37 = vpop.permute.xlu1 %732 }
  0xba   : > { %v725_v39 = vpop.permute.xlu0 %724  ;;  %v803_v18 = vadd.f32 %v783_v11, %v705_v13 }
  0xbb   : > { %v781_v40 = vmul.f32 %v2831_v34, %v725_v39  ;;  %v782_v41 = vmul.f32 %v2833_v35, %v725_v39  ;;  %v511_v39 = vmul.f32 %v2797_v58, %v2789_v44  ;;  %v688_v44 = vmul.f32 %v2807_v0, %v2757_v27 }
  0xbd   : > { %v802_v45 = vadd.f32 %v782_v41, %v704_v38  ;;  %v801_v47 = vadd.f32 %v781_v40, %v703_v42  ;;  %v592_v38 = vmul.f32 %v2795_v57, %v2787_v43  ;;  %v589_v41 = vmul.f32 %v2793_v56, %v2762_v29 }
  0xbe   : > { %v466_v46 = vpop.permute.xlu1 %465  ;;  %v590_v42 = vmul.f32 %v2795_v57, %v2762_v29  ;;  %v514_v43 = vmul.f32 %v2799_v59, %v2780_v36  ;;  %v690_v29 = vmul.f32 %v2807_v0, %v2818_v14 }
  0xbf   : > { %v882_v48 = vadd.f32 %v834_v52, %v802_v45  ;;  %v881_v54 = vadd.f32 %v834_v52, %v801_v47  ;;  %v517_v26 = vmul.f32 %v2797_v58, %v466_v46  ;;  %v518_v61 = vmul.f32 %v2799_v59, %v466_v46 }
  0xc0   : > { %v686_v52 = vmul.f32 %v2807_v0, %v2769_v32  ;;  %v687_v45 = vmul.f32 %v2805_v63, %v2757_v27  ;;  %v513_v46 = vmul.f32 %v2797_v58, %v2780_v36  ;;  %v609_v47 = vadd.f32 %v589_v41, %v511_v39 }
  0xc1   : > { %v902_v49 = vmax.f32 %v882_v48, 0.0  ;;  %v901_v7 = vmax.f32 %v881_v54, 0.0  ;;  %v610_v48 = vadd.f32 %v590_v42, %v512_v21  ;;  %v612_v51 = vadd.f32 %v592_v38, %v514_v43 }
  0xc2   : > { %v706_v17 = vadd.f32 %v686_v52, %v608_v10  ;;  %v611_v50 = vadd.f32 %v591_v55, %v513_v46  ;;  %v786_v27 = vmul.f32 %v2833_v35, %v2835_v37 }
  0xc3   : > { %v549_v53 = vpop.permute.xlu1 %548  ;;  %953 = vxpose.xlu0.b32.start [1/10] (short) %v902_v49, 128  ;;  %v689_v49 = vmul.f32 %v2805_v63, %v2818_v14  ;;  %v708_v2 = vadd.f32 %v688_v44, %v610_v48  ;;  %v741_v44 = vpop.permute.xlu0 %740 }
  0xc4   : > { %v595_v62 = vmul.f32 %v2793_v56, %v549_v53  ;;  %v596_v1 = vmul.f32 %v2795_v57, %v549_v53  ;;  %v804_v19 = vadd.f32 %v784_v12, %v706_v17  ;;  %v785_v53 = vmul.f32 %v2831_v34, %v2835_v37  ;;  %v2540_v37 = vld [vmem:[%s3220_s3] sm:$0xff]   ;;  %v2541_v17 = vld [vmem:[%s3220_s3 + $0x8] sm:$0xff]  }
  0xc5   : > { %v806_v52 = vadd.f32 %v786_v27, %v708_v2  ;;  %2259 = vmatprep.subr.bf16.mxu0 %v2540_v37  ;;  %2385 = vmatprep.subr.bf16.mxu1 %v2540_v37  ;;  %v789_v46 = vmul.f32 %v2831_v34, %v741_v44  ;;  %v790_v43 = vmul.f32 %v2833_v35, %v741_v44  ;;  %v2543_v2 = vld [vmem:[%s3220_s3 + $0x18] sm:$0xff]  }
  0xc6   : > { %v2857_v5 = vadd.f32 %v595_v62, %v517_v26  ;;  %v2859_v6 = vadd.f32 %v596_v1, %v518_v61  ;;  %v709_v61 = vadd.f32 %v689_v49, %v611_v50  ;;  %v710_v62 = vadd.f32 %v690_v29, %v612_v51  ;;  %2260 = vmatpush3.bf16.msra.mxu0 %v2540_v37 }
  0xc7   : > { %v707_v1 = vadd.f32 %v687_v45, %v609_v47  ;;  %2390 = vmatpush3.bf16.msra.mxu1 %v2540_v37  ;;  %2261 = vmatprep.subr.bf16.mxu0 %v2541_v17  ;;  %v809_v48 = vadd.f32 %v789_v46, %v2820_v15  ;;  %v810_v49 = vadd.f32 %v790_v43, %v2822_v16 }
  0xc8   : > { %v737_v20 = vpop.permute.xlu1 %736  ;;  %2386 = vmatprep.subr.bf16.mxu1 %v2541_v17 }
  0xc9   : > { %921 = vxpose.xlu1.b32.start [1/10] (short) %v901_v7, 128  ;;  %v787_v54 = vmul.f32 %v2831_v34, %v737_v20  ;;  %v788_v36 = vmul.f32 %v2833_v35, %v737_v20  ;;  %v805_v24 = vadd.f32 %v785_v53, %v707_v1 }
  0xca   : > { %2262 = vmatpush3.bf16.msra.mxu0 %v2541_v17 }
  0xcb   : > { %v807_v4 = vadd.f32 %v787_v54, %v709_v61  ;;  %v808_v14 = vadd.f32 %v788_v36, %v710_v62  ;;  %2391 = vmatpush3.bf16.msra.mxu1 %v2541_v17  ;;  %v2542_v36 = vld [vmem:[%s3220_s3 + $0x10] sm:$0xff]  }
  0xcc   : > { %2263 = vmatprep.subr.bf16.mxu0 %v2542_v36  ;;  %2387 = vmatprep.subr.bf16.mxu1 %v2542_v36 }
  0xcd   : > { %v839_v32 = vpop.permute.xlu1 %838  ;;  %v887_v11 = vadd.f32 %v2813_v9, %v807_v4  ;;  %v888_v12 = vadd.f32 %v2813_v9, %v808_v14  ;;  %v697_v9 = vmul.f32 %v2805_v63, %v2774_v33 }
  0xce   : > { %v883_v22 = vadd.f32 %v839_v32, %v803_v18  ;;  %v884_v28 = vadd.f32 %v839_v32, %v804_v19  ;;  %v599_v18 = vmul.f32 %v2793_v56, %v2752_v25  ;;  %v600_v32 = vmul.f32 %v2795_v57, %v2752_v25  ;;  %2264 = vmatpush3.bf16.msra.mxu0 %v2542_v36 }
  0xcf   : > { %v908_v39 = vmax.f32 %v888_v12, 0.0  ;;  %2392 = vmatpush3.bf16.msra.mxu1 %v2542_v36  ;;  %2265 = vmatprep.subr.bf16.mxu0 %v2543_v2 }
  0xd0   : > { %v903_v30 = vmax.f32 %v883_v22, 0.0  ;;  %v904_v31 = vmax.f32 %v884_v28, 0.0  ;;  %2388 = vmatprep.subr.bf16.mxu1 %v2543_v2 }
  0xd2   : > { %v2873_v40 = vpop.permute.xlu1 %552  ;;  %954 = vxpose.xlu0.b32.cont [2/10] (short) %v904_v31, 128  ;;  %922 = vxpose.xlu1.b32.cont [2/10] (short) %v903_v30, 128  ;;  %v698_v30 = vmul.f32 %v2807_v0, %v2774_v33  ;;  %v907_v31 = vmax.f32 %v887_v11, 0.0 }
  0xd3   : > { %2266 = vmatpush3.bf16.msra.mxu0 %v2543_v2  ;;  %2393 = vmatpush3.bf16.msra.mxu1 %v2543_v2 }
  0xd7   : > { %v2897_v26 = vpop.permute.xlu1 %646 }
  0xd8   : > { %v693_v61 = vmul.f32 %v2805_v63, %v2897_v26  ;;  %v694_v15 = vmul.f32 %v2807_v0, %v2897_v26  ;;  %v519_v26 = vmul.f32 %v2797_v58, %v2801_v60 }
  0xda   : > { %v713_v4 = vadd.f32 %v693_v61, %v2857_v5  ;;  %v714_v14 = vadd.f32 %v694_v15, %v2859_v6  ;;  %v520_v5 = vmul.f32 %v2799_v59, %v2801_v60  ;;  %v598_v6 = vmul.f32 %v2795_v57, %v2873_v40 }
  0xdc   : > { %v844_v7 = vpop.permute.xlu1 %843 }
  0xdd   : > { %v885_v8 = vadd.f32 %v844_v7, %v805_v24  ;;  %v886_v10 = vadd.f32 %v844_v7, %v806_v52  ;;  %v597_v24 = vmul.f32 %v2793_v56, %v2873_v40  ;;  %v618_v40 = vadd.f32 %v598_v6, %v520_v5 }
  0xdf   : > { %v905_v20 = vmax.f32 %v885_v8, 0.0  ;;  %v906_v13 = vmax.f32 %v886_v10, 0.0  ;;  %v2544_v8 = vld [vmem:[%s3220_s3 + $0x20] sm:$0xff]   ;;  %v753_v10 = vpop.permute.xlu0 %752 }
  0xe0   : > { %v476_v19 = vpop.permute.xlu1 %475  ;;  %2267 = vmatprep.subr.bf16.mxu0 %v2544_v8  ;;  %2389 = vmatprep.subr.bf16.mxu1 %v2544_v8  ;;  %v795_v46 = vmul.f32 %v2831_v34, %v753_v10 }
  0xe1   : > { %v521_v22 = vmul.f32 %v2797_v58, %v476_v19  ;;  %v522_v28 = vmul.f32 %v2799_v59, %v476_v19  ;;  %955 = vxpose.xlu0.b32.cont [3/10] (short) %v906_v13, 128  ;;  %923 = vxpose.xlu1.b32.cont [3/10] (short) %v905_v20, 128  ;;  %v617_v20 = vadd.f32 %v597_v24, %v519_v26 }
  0xe2   : > { %2268 = vmatpush3.bf16.msra.mxu0 %v2544_v8  ;;  %2394 = vmatpush3.bf16.msra.mxu1 %v2544_v8 }
  0xe3   : > { %v619_v21 = vadd.f32 %v599_v18, %v521_v22  ;;  %v620_v55 = vadd.f32 %v600_v32, %v522_v28 }
  0xe5   : > { %v651_v25 = vpop.permute.xlu1 %650  ;;  %956 = vxpose.xlu0.b32.cont [4/10] (short) %v908_v39, 128  ;;  %924 = vxpose.xlu1.b32.cont [4/10] (short) %v907_v31, 128  ;;  %v2917_v38 = vadd.f32 %v697_v9, %v619_v21  ;;  %v2919_v41 = vadd.f32 %v698_v30, %v620_v55  ;;  %v757_v9 = vpop.permute.xlu0 %756 }
  0xe6   : > { %v695_v13 = vmul.f32 %v2805_v63, %v651_v25  ;;  %v696_v17 = vmul.f32 %v2807_v0, %v651_v25 }
  0xe7   : > { %v815_v2 = vadd.f32 %v795_v46, %v2917_v38 }
  0xe8   : > { %v715_v25 = vadd.f32 %v695_v13, %v617_v20 }
  0xe9   : > { %v761_v36 = vpop.permute.xlu0 %760 }
  0xea   : > { %v745_v42 = vpop.permute.xlu1 %744  ;;  %v800_v5 = vmul.f32 %v2833_v35, %v761_v36 }
  0xeb   : > { %v791_v16 = vmul.f32 %v2831_v34, %v745_v42  ;;  %v792_v62 = vmul.f32 %v2833_v35, %v745_v42  ;;  %v716_v42 = vadd.f32 %v696_v17, %v618_v40 }
  0xed   : > { %v811_v52 = vadd.f32 %v791_v16, %v713_v4  ;;  %v812_v7 = vadd.f32 %v792_v62, %v714_v14  ;;  %v874_v26 = vpop.permute.xlu0 %873 }
  0xef   : > { %v481_v45 = vpop.permute.xlu1 %480 }
  0xf0   : > { %v523_v22 = vmul.f32 %v2797_v58, %v481_v45  ;;  %v524_v28 = vmul.f32 %v2799_v59, %v481_v45  ;;  %v796_v45 = vmul.f32 %v2833_v35, %v753_v10 }
  0xf4   : > { %v561_v33 = vpop.permute.xlu1 %560 }
  0xf5   : > { %v601_v18 = vmul.f32 %v2793_v56, %v561_v33  ;;  %v602_v19 = vmul.f32 %v2795_v57, %v561_v33 }
  0xf7   : > { %v621_v33 = vadd.f32 %v601_v18, %v523_v22  ;;  %v622_v44 = vadd.f32 %v602_v19, %v524_v28 }
  0xf9   : > { %v749_v47 = vpop.permute.xlu1 %748 }
  0xfa   : > { %v793_v30 = vmul.f32 %v2831_v34, %v749_v47  ;;  %v794_v31 = vmul.f32 %v2833_v35, %v749_v47 }
  0xfe   : > { %v854_v29 = vpop.permute.xlu1 %853 }
  0xff   : > { %v889_v50 = vadd.f32 %v854_v29, %v809_v48  ;;  %v890_v51 = vadd.f32 %v854_v29, %v810_v49  ;;  %v813_v29 = vadd.f32 %v793_v30, %v715_v25 }
 0x101   : > { %v909_v53 = vmax.f32 %v889_v50, 0.0  ;;  %v910_v27 = vmax.f32 %v890_v51, 0.0  ;;  %v814_v50 = vadd.f32 %v794_v31, %v716_v42  ;;  %v525_v51 = vmul.f32 %v2797_v58, %v2827_v23 }
 0x102   : > { %v816_v58 = vadd.f32 %v796_v45, %v2919_v41 }
 0x103   : > { %v565_v54 = vpop.permute.xlu1 %564  ;;  %957 = vxpose.xlu0.b32.cont [5/10] (short) %v910_v27, 128  ;;  %925 = vxpose.xlu1.b32.cont [5/10] (short) %v909_v53, 128  ;;  %v526_v53 = vmul.f32 %v2799_v59, %v2827_v23  ;;  %v797_v27 = vmul.f32 %v2831_v34, %v757_v9 }
 0x104   : > { %v603_v43 = vmul.f32 %v2793_v56, %v565_v54  ;;  %v604_v48 = vmul.f32 %v2795_v57, %v565_v54  ;;  %v798_v56 = vmul.f32 %v2833_v35, %v757_v9  ;;  %v2545_v35 = vld [vmem:[%s3222_s5] sm:$0xff]  }
 0x105   : > { %2301 = vmatprep.subr.bf16.mxu1 %v2545_v35 }
 0x106   : > { %v623_v62 = vadd.f32 %v603_v43, %v525_v51  ;;  %v2546_v51 = vld [vmem:[%s3222_s5 + $0x8] sm:$0xff]  }
 0x108   : > { %v659_v1 = vpop.permute.xlu1 %658 }
 0x109   : > { %v699_v39 = vmul.f32 %v2805_v63, %v659_v1  ;;  %v700_v21 = vmul.f32 %v2807_v0, %v659_v1  ;;  %v624_v1 = vadd.f32 %v604_v48, %v526_v53 }
 0x10b   : > { %v719_v47 = vadd.f32 %v699_v39, %v621_v33  ;;  %v720_v49 = vadd.f32 %v700_v21, %v622_v44 }
 0x10d   : > { %v859_v37 = vpop.permute.xlu1 %858  ;;  %v817_v4 = vadd.f32 %v797_v27, %v719_v47  ;;  %v818_v59 = vadd.f32 %v798_v56, %v720_v49 }
 0x10e   : > { %v891_v11 = vadd.f32 %v859_v37, %v811_v52  ;;  %v892_v12 = vadd.f32 %v859_v37, %v812_v7 }
 0x10f   : > { %v897_v6 = vadd.f32 %v874_v26, %v817_v4  ;;  %v898_v38 = vadd.f32 %v874_v26, %v818_v59 }
 0x110   : > { %v911_v32 = vmax.f32 %v891_v11, 0.0  ;;  %v912_v60 = vmax.f32 %v892_v12, 0.0 }
 0x111   : > { %v917_v20 = vmax.f32 %v897_v6, 0.0  ;;  %v918_v13 = vmax.f32 %v898_v38, 0.0 }
 0x112   : > { %v663_v55 = vpop.permute.xlu1 %662  ;;  %958 = vxpose.xlu0.b32.cont [6/10] (short) %v912_v60, 128  ;;  %926 = vxpose.xlu1.b32.cont [6/10] (short) %v911_v32, 128 }
 0x113   : > { %v701_v61 = vmul.f32 %v2805_v63, %v663_v55  ;;  %v702_v57 = vmul.f32 %v2807_v0, %v663_v55  ;;  %v799_v0 = vmul.f32 %v2831_v34, %v761_v36  ;;  %v1974_v34 = vld [vmem:[%s3227_s10] sm:$0x7]  ;;  %v2547_v36 = vld [vmem:[%s3222_s5 + $0x10] sm:$0xff]  }
 0x115   : > { %v721_v24 = vadd.f32 %v701_v61, %v623_v62  ;;  %v722_v52 = vadd.f32 %v702_v57, %v624_v1 }
 0x117   : > { %v864_v15 = vpop.permute.xlu1 %863  ;;  %v819_v11 = vadd.f32 %v799_v0, %v721_v24  ;;  %v820_v12 = vadd.f32 %v800_v5, %v722_v52 }
 0x118   : > { %v893_v54 = vadd.f32 %v864_v15, %v813_v29  ;;  %v894_v16 = vadd.f32 %v864_v15, %v814_v50 }
 0x11a   : > { %v913_v23 = vmax.f32 %v893_v54, 0.0  ;;  %v914_v14 = vmax.f32 %v894_v16, 0.0 }
 0x11b   : > { %v869_v63 = vpop.permute.xlu1 %868 }
 0x11c   : > { %v895_v7 = vadd.f32 %v869_v63, %v815_v2  ;;  %v896_v8 = vadd.f32 %v869_v63, %v816_v58  ;;  %959 = vxpose.xlu0.b32.cont [7/10] (short) %v914_v14, 128  ;;  %927 = vxpose.xlu1.b32.cont [7/10] (short) %v913_v23, 128 }
 0x11e   : > { %v915_v10 = vmax.f32 %v895_v7, 0.0  ;;  %v916_v41 = vmax.f32 %v896_v8, 0.0 }
 0x11f   : > { %v879_v37 = vpop.permute.xlu1 %878 }
 0x120   : > { %960 = vxpose.xlu0.b32.cont [8/10] (short) %v916_v41, 128  ;;  %928 = vxpose.xlu1.b32.cont [8/10] (short) %v915_v10, 128  ;;  %v899_v17 = vadd.f32 %v879_v37, %v819_v11  ;;  %v900_v18 = vadd.f32 %v879_v37, %v820_v12  ;;  %v2548_v10 = vld [vmem:[%s3222_s5 + $0x18] sm:$0xff]   ;;  %v2549_v41 = vld [vmem:[%s3222_s5 + $0x20] sm:$0xff]   ;;  %v2551_v11 = vld [vmem:[%s3224_s7 + $0x8] sm:$0xff]  }
 0x121   : > { %v2550_v37 = vld [vmem:[%s3224_s7] sm:$0xff]   ;;  %v2552_v12 = vld [vmem:[%s3224_s7 + $0x10] sm:$0xff]  }
 0x122   : > { %v919_v19 = vmax.f32 %v899_v17, 0.0  ;;  %v920_v32 = vmax.f32 %v900_v18, 0.0  ;;  %2343 = vmatprep.subr.bf16.mxu0 %v2550_v37 }
 0x124   : > { %961 = vxpose.xlu0.b32.cont [9/10] (short) %v918_v13, 128  ;;  %929 = vxpose.xlu1.b32.cont [9/10] (short) %v917_v20, 128  ;;  %v3031_v20 = vld [vmem:[%s3221_s4] ss:$0 sm:$0xff] }
 0x128   : > { %962 = vxpose.xlu0.b32.end [10/10] (short) %v920_v32, 128  ;;  %930 = vxpose.xlu1.b32.end [10/10] (short) %v919_v19, 128 }
 0x15e   : > { %1977 = vperm.xlu1 %2456, %v1974_v34  }
 0x184   : > { %v937_v60 = vpop.trf.xlu1  ;;  %v2982_v40 = vpop.trf.xlu0 }
 0x188   : > { %v938_v22 = vpop.trf.xlu1  ;;  %v2984_v28 = vpop.trf.xlu0 }
 0x189   : > { %v985_v9 = vpack.c.bf16 %v938_v22, %v937_v60  ;;  %v993_v6 = vpack.c.bf16 %v2984_v28, %v2982_v40 }
 0x18b   : > { %2269 = vmatprep.mubr.msk.bf16.mxu0 %vm1048_vm0, %v985_v9 }
 0x18c   : > { %v939_v30 = vpop.trf.xlu1  ;;  %v2987_v31 = vpop.trf.xlu0 }
 0x190   : > { %v940_v39 = vpop.trf.xlu1  ;;  %v972_v21 = vpop.trf.xlu0 }
 0x191   : > { %v986_v55 = vpack.c.bf16 %v940_v39, %v939_v30  ;;  %v994_v38 = vpack.c.bf16 %v972_v21, %v2987_v31 }
 0x193   : > { %2270 = vmatmul.mubr.msk.bf16.vlgmr.msra.gmra.mrb[0].mxu0 %vm1048_vm0, %v986_v55 }
 0x194   : > { %v941_v25 = vpop.trf.xlu1  ;;  %v973_v42 = vpop.trf.xlu0  ;;  %2344 = vmatpush3.bf16.msra.mxu0 %v2550_v37 }
 0x195   : > { %2345 = vmatprep.subr.bf16.mxu0 %v2551_v11 }
 0x198   : > { %v942_v33 = vpop.trf.xlu1  ;;  %v974_v44 = vpop.trf.xlu0  ;;  %2346 = vmatpush3.bf16.msra.mxu0 %v2551_v11 }
 0x199   : > { %v987_v46 = vpack.c.bf16 %v942_v33, %v941_v25  ;;  %v995_v45 = vpack.c.bf16 %v974_v44, %v973_v42  ;;  %2347 = vmatprep.subr.bf16.mxu0 %v2552_v12 }
 0x19b   : > { %2273 = vmatprep.mubr.msk.bf16.mxu0 %vm1048_vm0, %v987_v46  ;;  %2289 = vmatprep.mubr.msk.bf16.mxu1 %vm1048_vm0, %v995_v45 }
 0x19c   : > { %v943_v43 = vpop.trf.xlu1  ;;  %v975_v48 = vpop.trf.xlu0  ;;  %2348 = vmatpush3.bf16.msra.mxu0 %v2552_v12 }
 0x1a0   : > { %v944_v47 = vpop.trf.xlu1  ;;  %v976_v49 = vpop.trf.xlu0 }
 0x1a1   : > { %v988_v29 = vpack.c.bf16 %v944_v47, %v943_v43  ;;  %v996_v50 = vpack.c.bf16 %v976_v49, %v975_v48 }
 0x1a3   : > { %2274 = vmatmul.mubr.msk.bf16.gmra.mrb[4].mxu0 %vm1048_vm0, %v988_v29  ;;  %2290 = vmatmul.mubr.msk.bf16.vlgmr.msra.gmra.mrb[0].mxu1 %vm1048_vm0, %v996_v50 }
 0x1a4   : > { %v945_v53 = vpop.trf.xlu1  ;;  %v977_v27 = vpop.trf.xlu0  ;;  %2302 = vmatpush3.bf16.msra.mxu1 %v2545_v35 }
 0x1a5   : > { %2303 = vmatprep.subr.bf16.mxu1 %v2546_v51 }
 0x1a8   : > { %v946_v61 = vpop.trf.xlu1  ;;  %v978_v15 = vpop.trf.xlu0  ;;  %2304 = vmatpush3.bf16.msra.mxu1 %v2546_v51 }
 0x1a9   : > { %v989_v56 = vpack.c.bf16 %v946_v61, %v945_v53  ;;  %v997_v57 = vpack.c.bf16 %v978_v15, %v977_v27  ;;  %2305 = vmatprep.subr.bf16.mxu1 %v2547_v36 }
 0x1ab   : > { %2277 = vmatprep.mubr.msk.bf16.mxu0 %vm1048_vm0, %v989_v56  ;;  %2293 = vmatprep.mubr.msk.bf16.mxu1 %vm1048_vm0, %v997_v57 }
 0x1ac   : > { %v947_v54 = vpop.trf.xlu1  ;;  %v979_v16 = vpop.trf.xlu0  ;;  %2306 = vmatpush3.bf16.msra.mxu1 %v2547_v36 }
 0x1ad   : > { %2307 = vmatprep.subr.bf16.mxu1 %v2548_v10 }
 0x1b0   : > { %v948_v62 = vpop.trf.xlu1  ;;  %v980_v1 = vpop.trf.xlu0  ;;  %2308 = vmatpush3.bf16.msra.mxu1 %v2548_v10 }
 0x1b1   : > { %v990_v2 = vpack.c.bf16 %v948_v62, %v947_v54  ;;  %v998_v58 = vpack.c.bf16 %v980_v1, %v979_v16  ;;  %2309 = vmatprep.subr.bf16.mxu1 %v2549_v41 }
 0x1b3   : > { %2278 = vmatmul.mubr.msk.bf16.gmra.mrb[8].mxu0 %vm1048_vm0, %v990_v2  ;;  %2294 = vmatmul.mubr.msk.bf16.gmra.mrb[4].mxu1 %vm1048_vm0, %v998_v58 }
 0x1b4   : > { %v949_v4 = vpop.trf.xlu1  ;;  %v981_v59 = vpop.trf.xlu0  ;;  %2310 = vmatpush3.bf16.msra.mxu1 %v2549_v41 }
 0x1b8   : > { %v950_v23 = vpop.trf.xlu1  ;;  %v982_v14 = vpop.trf.xlu0 }
 0x1b9   : > { %v991_v26 = vpack.c.bf16 %v950_v23, %v949_v4  ;;  %v999_v24 = vpack.c.bf16 %v982_v14, %v981_v59 }
 0x1bb   : > { %2281 = vmatprep.mubr.msk.bf16.mxu0 %vm1048_vm0, %v991_v26  ;;  %2297 = vmatprep.mubr.msk.bf16.mxu1 %vm1048_vm0, %v999_v24 }
 0x1bc   : > { %v951_v63 = vpop.trf.xlu1  ;;  %v983_v52 = vpop.trf.xlu0 }
 0x1c0   : > { %v952_v7 = vpop.trf.xlu1  ;;  %v984_v8 = vpop.trf.xlu0 }
 0x1c1   : > { %v992_v0 = vpack.c.bf16 %v952_v7, %v951_v63  ;;  %v1000_v5 = vpack.c.bf16 %v984_v8, %v983_v52 }
 0x1c3   : > { %2282 = vmatmul.mubr.msk.bf16.gmra.mrb[12].mxu0 %vm1048_vm0, %v992_v0  ;;  %2298 = vmatmul.mubr.msk.bf16.gmra.mrb[8].mxu1 %vm1048_vm0, %v1000_v5 }
 0x1c4   : > { %2285 = vmatprep.mubr.msk.bf16.mxu0 %vm1048_vm0, %v993_v6 }
 0x1cb   : > { %2286 = vmatmul.mubr.msk.bf16.gmra.mrb[16].mxu0 %vm1048_vm0, %v994_v38 }
 0x266   : > { %v2271_v13 = vpop.f32.mrb[0].mxu0 }
 0x267   : > { %v1140_v17 = vadd.f32 %v2271_v13, %v3031_v20  ;;  %v1131_v18 = vpop.f32.mrb[1].mxu0 }
 0x268   : > { %v1132_v19 = vadd.f32 %v3031_v20, %v1131_v18  ;;  %v2272_v32 = vpop.f32.mrb[2].mxu0 }
 0x269   : > { %v1143_v34 = vadd.f32 %v2272_v32, %v3031_v20  ;;  %v1134_v35 = vpop.f32.mrb[3].mxu0  ;;  %v1260_v40 = vmax.f32 %v1140_v17, 0.0 }
 0x26a   : > { %v1135_v60 = vadd.f32 %v3031_v20, %v1134_v35  ;;  %v1258_v28 = vmax.f32 %v1132_v19, 0.0 }
 0x26b   : > { %v1261_v22 = vmax.f32 %v1143_v34, 0.0 }
 0x26c   : > { %v1259_v9 = vmax.f32 %v1135_v60, 0.0 }
 0x26d   : > { %v1291_v30 = vpack.c.bf16 %v1261_v22, %v1260_v40 }
 0x26e   : > { %v1290_v31 = vpack.c.bf16 %v1259_v9, %v1258_v28 }
 0x270   : > { %2311 = vmatprep.mubr.msk.bf16.mxu1 %vm1048_vm0, %v1290_v31 }
 0x271   : > { %2312 = vmatmul.mubr.msk.bf16.vlgmr.msra.gmra.mrb[12].mxu1 %vm1048_vm0, %v1291_v30 }
 0x276   : > { %v2275_v39 = vpop.f32.mrb[4].mxu0  ;;  %v2291_v21 = vpop.f32.mrb[0].mxu1 }
 0x277   : > { %v1156_v55 = vadd.f32 %v2275_v39, %v3031_v20  ;;  %v1147_v25 = vpop.f32.mrb[5].mxu0  ;;  %v1220_v42 = vadd.f32 %v2291_v21, %v3031_v20  ;;  %v1211_v33 = vpop.f32.mrb[1].mxu1 }
 0x278   : > { %v1148_v44 = vadd.f32 %v3031_v20, %v1147_v25  ;;  %v2276_v46 = vpop.f32.mrb[6].mxu0  ;;  %v1212_v45 = vadd.f32 %v3031_v20, %v1211_v33  ;;  %v2292_v43 = vpop.f32.mrb[2].mxu1 }
 0x279   : > { %v1159_v48 = vadd.f32 %v2276_v46, %v3031_v20  ;;  %v1150_v47 = vpop.f32.mrb[7].mxu0  ;;  %v1280_v49 = vmax.f32 %v1220_v42, 0.0  ;;  %v1223_v29 = vadd.f32 %v2292_v43, %v3031_v20  ;;  %v1214_v50 = vpop.f32.mrb[3].mxu1  ;;  %v1264_v36 = vmax.f32 %v1156_v55, 0.0 }
 0x27a   : > { %v1151_v51 = vadd.f32 %v3031_v20, %v1150_v47  ;;  %v1278_v53 = vmax.f32 %v1212_v45, 0.0  ;;  %v1215_v27 = vadd.f32 %v3031_v20, %v1214_v50  ;;  %v1262_v56 = vmax.f32 %v1148_v44, 0.0 }
 0x27b   : > { %v1265_v61 = vmax.f32 %v1159_v48, 0.0  ;;  %v1281_v15 = vmax.f32 %v1223_v29, 0.0 }
 0x27c   : > { %v1263_v57 = vmax.f32 %v1151_v51, 0.0  ;;  %v1279_v54 = vmax.f32 %v1215_v27, 0.0 }
 0x27d   : > { %v1293_v16 = vpack.c.bf16 %v1265_v61, %v1264_v36  ;;  %v3047_v62 = vpack.c.bf16 %v1281_v15, %v1280_v49 }
 0x27e   : > { %v1292_v1 = vpack.c.bf16 %v1263_v57, %v1262_v56  ;;  %v3049_v2 = vpack.c.bf16 %v1279_v54, %v1278_v53 }
 0x280   : > { %2315 = vmatprep.mubr.msk.bf16.mxu1 %vm1048_vm0, %v1292_v1 }
 0x281   : > { %2316 = vmatmul.mubr.msk.bf16.gmra.mrb[16].mxu1 %vm1048_vm0, %v1293_v16 }
 0x286   : > { %v2279_v58 = vpop.f32.mrb[8].mxu0  ;;  %v2295_v4 = vpop.f32.mrb[4].mxu1 }
 0x287   : > { %v1172_v59 = vadd.f32 %v2279_v58, %v3031_v20  ;;  %v1163_v23 = vpop.f32.mrb[9].mxu0  ;;  %v1236_v14 = vadd.f32 %v2295_v4, %v3031_v20  ;;  %v1227_v26 = vpop.f32.mrb[5].mxu1 }
 0x288   : > { %v1164_v24 = vadd.f32 %v3031_v20, %v1163_v23  ;;  %v2280_v63 = vpop.f32.mrb[10].mxu0  ;;  %v1228_v52 = vadd.f32 %v3031_v20, %v1227_v26  ;;  %v2296_v7 = vpop.f32.mrb[6].mxu1 }
 0x289   : > { %v1175_v8 = vadd.f32 %v2280_v63, %v3031_v20  ;;  %v1166_v0 = vpop.f32.mrb[11].mxu0  ;;  %v1284_v5 = vmax.f32 %v1236_v14, 0.0  ;;  %v1239_v6 = vadd.f32 %v2296_v7, %v3031_v20  ;;  %v1230_v38 = vpop.f32.mrb[7].mxu1  ;;  %v1268_v11 = vmax.f32 %v1172_v59, 0.0 }
 0x28a   : > { %v1167_v10 = vadd.f32 %v3031_v20, %v1166_v0  ;;  %v1282_v41 = vmax.f32 %v1228_v52, 0.0  ;;  %v1231_v37 = vadd.f32 %v3031_v20, %v1230_v38  ;;  %v1266_v17 = vmax.f32 %v1164_v24, 0.0 }
 0x28b   : > { %v1269_v12 = vmax.f32 %v1175_v8, 0.0  ;;  %v1285_v13 = vmax.f32 %v1239_v6, 0.0 }
 0x28c   : > { %v1267_v18 = vmax.f32 %v1167_v10, 0.0  ;;  %v1283_v19 = vmax.f32 %v1231_v37, 0.0 }
 0x28d   : > { %v1295_v32 = vpack.c.bf16 %v1269_v12, %v1268_v11  ;;  %v1303_v34 = vpack.c.bf16 %v1285_v13, %v1284_v5 }
 0x28e   : > { %v1294_v35 = vpack.c.bf16 %v1267_v18, %v1266_v17  ;;  %v1302_v60 = vpack.c.bf16 %v1283_v19, %v1282_v41 }
 0x290   : > { %2319 = vmatprep.mubr.msk.bf16.mxu1 %vm1048_vm0, %v1294_v35 }
 0x291   : > { %2320 = vmatmul.mubr.msk.bf16.gmra.mrb[20].mxu1 %vm1048_vm0, %v1295_v32 }
 0x296   : > { %v2283_v40 = vpop.f32.mrb[12].mxu0  ;;  %v2299_v22 = vpop.f32.mrb[8].mxu1 }
 0x297   : > { %v1188_v28 = vadd.f32 %v2283_v40, %v3031_v20  ;;  %v1179_v9 = vpop.f32.mrb[13].mxu0  ;;  %v1252_v30 = vadd.f32 %v2299_v22, %v3031_v20  ;;  %v1243_v31 = vpop.f32.mrb[9].mxu1 }
 0x298   : > { %v1180_v39 = vadd.f32 %v3031_v20, %v1179_v9  ;;  %v2284_v21 = vpop.f32.mrb[14].mxu0  ;;  %v1244_v55 = vadd.f32 %v3031_v20, %v1243_v31  ;;  %v2300_v25 = vpop.f32.mrb[10].mxu1 }
 0x299   : > { %v1191_v42 = vadd.f32 %v2284_v21, %v3031_v20  ;;  %v1182_v33 = vpop.f32.mrb[15].mxu0  ;;  %v1288_v44 = vmax.f32 %v1252_v30, 0.0  ;;  %v1255_v46 = vadd.f32 %v2300_v25, %v3031_v20  ;;  %v1246_v45 = vpop.f32.mrb[11].mxu1  ;;  %v1272_v49 = vmax.f32 %v1188_v28, 0.0 }
 0x29a   : > { %v1183_v43 = vadd.f32 %v3031_v20, %v1182_v33  ;;  %v1286_v48 = vmax.f32 %v1244_v55, 0.0  ;;  %v1247_v47 = vadd.f32 %v3031_v20, %v1246_v45  ;;  %v1270_v51 = vmax.f32 %v1180_v39, 0.0 }
 0x29b   : > { %v1273_v29 = vmax.f32 %v1191_v42, 0.0  ;;  %v1289_v50 = vmax.f32 %v1255_v46, 0.0 }
 0x29c   : > { %v1271_v53 = vmax.f32 %v1183_v43, 0.0  ;;  %v1287_v27 = vmax.f32 %v1247_v47, 0.0 }
 0x29d   : > { %v1297_v36 = vpack.c.bf16 %v1273_v29, %v1272_v49  ;;  %v1305_v61 = vpack.c.bf16 %v1289_v50, %v1288_v44 }
 0x29e   : > { %v1296_v15 = vpack.c.bf16 %v1271_v53, %v1270_v51  ;;  %v2287_v56 = vpop.f32.mrb[16].mxu0  ;;  %v1304_v57 = vpack.c.bf16 %v1287_v27, %v1286_v48 }
 0x29f   : > { %v1204_v54 = vadd.f32 %v2287_v56, %v3031_v20  ;;  %v1195_v16 = vpop.f32.mrb[17].mxu0 }
 0x2a0   : > { %v1196_v1 = vadd.f32 %v3031_v20, %v1195_v16  ;;  %v2288_v58 = vpop.f32.mrb[18].mxu0  ;;  %2323 = vmatprep.mubr.msk.bf16.mxu1 %vm1048_vm0, %v1296_v15 }
 0x2a1   : > { %v1207_v4 = vadd.f32 %v2288_v58, %v3031_v20  ;;  %v1198_v59 = vpop.f32.mrb[19].mxu0  ;;  %2324 = vmatmul.mubr.msk.bf16.gmra.mrb[24].mxu1 %vm1048_vm0, %v1297_v36  ;;  %v1276_v14 = vmax.f32 %v1204_v54, 0.0 }
 0x2a2   : > { %v1199_v23 = vadd.f32 %v3031_v20, %v1198_v59  ;;  %v1274_v24 = vmax.f32 %v1196_v1, 0.0  ;;  %v2553_v20 = vld [vmem:[%s3224_s7 + $0x18] sm:$0xff]  }
 0x2a3   : > { %v1277_v26 = vmax.f32 %v1207_v4, 0.0  ;;  %2349 = vmatprep.subr.bf16.mxu0 %v2553_v20 }
 0x2a4   : > { %v1275_v63 = vmax.f32 %v1199_v23, 0.0  ;;  %2350 = vmatpush3.bf16.msra.mxu0 %v2553_v20 }
 0x2a5   : > { %v1299_v52 = vpack.c.bf16 %v1277_v26, %v1276_v14 }
 0x2a6   : > { %v1298_v7 = vpack.c.bf16 %v1275_v63, %v1274_v24 }
 0x2a8   : > { %2327 = vmatprep.mubr.msk.bf16.mxu1 %vm1048_vm0, %v1298_v7 }
 0x2a9   : > { %2328 = vmatmul.mubr.msk.bf16.gmra.mrb[28].mxu1 %vm1048_vm0, %v1299_v52 }
 0x2aa   : > { %2331 = vmatprep.mubr.msk.bf16.mxu1 %vm1048_vm0, %v3049_v2  ;;  %v3097_v2 = vld [vmem:[%s3223_s6] ss:$0 sm:$0xff] }
 0x2b1   : > { %2332 = vmatmul.mubr.msk.bf16.gmra.mrb[32].mxu1 %vm1048_vm0, %v3047_v62  ;;  %v2554_v62 = vld [vmem:[%s3224_s7 + $0x20] sm:$0xff]  }
 0x2b2   : > { %2335 = vmatprep.mubr.msk.bf16.mxu1 %vm1048_vm0, %v1302_v60  ;;  %2351 = vmatprep.subr.bf16.mxu0 %v2554_v62 }
 0x2b3   : > { %2352 = vmatpush3.bf16.msra.mxu0 %v2554_v62 }
 0x2b9   : > { %2336 = vmatmul.mubr.msk.bf16.gmra.mrb[36].mxu1 %vm1048_vm0, %v1303_v34 }
 0x2ba   : > { %2339 = vmatprep.mubr.msk.bf16.mxu1 %vm1048_vm0, %v1304_v57 }
 0x2c1   : > { %2340 = vmatmul.mubr.msk.bf16.gmra.mrb[40].mxu1 %vm1048_vm0, %v1305_v61 }
 0x2c2   : > { %2015 = vmatprep.mubr.bf16.mxu1 %v2580_v3 }
 0x344   : > { %v2313_v8 = vpop.f32.mrb[12].mxu1 }
 0x345   : > { %v1444_v3 = vadd.f32 %v2313_v8, %v3097_v2  ;;  %v1435_v0 = vpop.f32.mrb[13].mxu1 }
 0x346   : > { %v1436_v5 = vadd.f32 %v3097_v2, %v1435_v0  ;;  %v2314_v6 = vpop.f32.mrb[14].mxu1 }
 0x347   : > { %v1447_v38 = vadd.f32 %v2314_v6, %v3097_v2  ;;  %v1438_v10 = vpop.f32.mrb[15].mxu1  ;;  %v1564_v37 = vmax.f32 %v1444_v3, 0.0 }
 0x348   : > { %v1439_v41 = vadd.f32 %v3097_v2, %v1438_v10  ;;  %v1562_v12 = vmax.f32 %v1436_v5, 0.0 }
 0x349   : > { %v1565_v11 = vmax.f32 %v1447_v38, 0.0 }
 0x34a   : > { %v1563_v13 = vmax.f32 %v1439_v41, 0.0 }
 0x34b   : > { %v1595_v17 = vpack.c.bf16 %v1565_v11, %v1564_v37 }
 0x34c   : > { %v1594_v18 = vpack.c.bf16 %v1563_v13, %v1562_v12 }
 0x34e   : > { %2353 = vmatprep.mubr.msk.bf16.mxu0 %vm1048_vm0, %v1594_v18 }
 0x34f   : > { %2354 = vmatmul.mubr.msk.bf16.vlgmr.msra.gmra.mrb[20].mxu0 %vm1048_vm0, %v1595_v17 }
 0x354   : > { %v2317_v19 = vpop.f32.mrb[16].mxu1 }
 0x355   : > { %v1460_v32 = vadd.f32 %v2317_v19, %v3097_v2  ;;  %v1451_v34 = vpop.f32.mrb[17].mxu1 }
 0x356   : > { %v1452_v35 = vadd.f32 %v3097_v2, %v1451_v34  ;;  %v2318_v60 = vpop.f32.mrb[18].mxu1 }
 0x357   : > { %v1463_v40 = vadd.f32 %v2318_v60, %v3097_v2  ;;  %v1454_v22 = vpop.f32.mrb[19].mxu1  ;;  %v1568_v9 = vmax.f32 %v1460_v32, 0.0 }
 0x358   : > { %v1455_v28 = vadd.f32 %v3097_v2, %v1454_v22  ;;  %v1566_v31 = vmax.f32 %v1452_v35, 0.0 }
 0x359   : > { %v1569_v30 = vmax.f32 %v1463_v40, 0.0 }
 0x35a   : > { %v1567_v39 = vmax.f32 %v1455_v28, 0.0 }
 0x35b   : > { %v1597_v21 = vpack.c.bf16 %v1569_v30, %v1568_v9 }
 0x35c   : > { %v1596_v55 = vpack.c.bf16 %v1567_v39, %v1566_v31 }
 0x35e   : > { %2357 = vmatprep.mubr.msk.bf16.mxu0 %vm1048_vm0, %v1596_v55 }
 0x35f   : > { %2358 = vmatmul.mubr.msk.bf16.gmra.mrb[24].mxu0 %vm1048_vm0, %v1597_v21 }
 0x364   : > { %v2321_v25 = vpop.f32.mrb[20].mxu1 }
 0x365   : > { %v1476_v42 = vadd.f32 %v2321_v25, %v3097_v2  ;;  %v1467_v33 = vpop.f32.mrb[21].mxu1 }
 0x366   : > { %v1468_v44 = vadd.f32 %v3097_v2, %v1467_v33  ;;  %v2322_v46 = vpop.f32.mrb[22].mxu1 }
 0x367   : > { %v1479_v45 = vadd.f32 %v2322_v46, %v3097_v2  ;;  %v1470_v43 = vpop.f32.mrb[23].mxu1  ;;  %v1572_v47 = vmax.f32 %v1476_v42, 0.0 }
 0x368   : > { %v1471_v48 = vadd.f32 %v3097_v2, %v1470_v43  ;;  %v1570_v29 = vmax.f32 %v1468_v44, 0.0 }
 0x369   : > { %v1573_v49 = vmax.f32 %v1479_v45, 0.0 }
 0x36a   : > { %v1571_v50 = vmax.f32 %v1471_v48, 0.0 }
 0x36b   : > { %v1599_v51 = vpack.c.bf16 %v1573_v49, %v1572_v47 }
 0x36c   : > { %v1598_v53 = vpack.c.bf16 %v1571_v50, %v1570_v29 }
 0x36e   : > { %2361 = vmatprep.mubr.msk.bf16.mxu0 %vm1048_vm0, %v1598_v53 }
 0x36f   : > { %2362 = vmatmul.mubr.msk.bf16.gmra.mrb[28].mxu0 %vm1048_vm0, %v1599_v51 }
 0x374   : > { %v2325_v27 = vpop.f32.mrb[24].mxu1 }
 0x375   : > { %v1492_v36 = vadd.f32 %v2325_v27, %v3097_v2  ;;  %v1483_v61 = vpop.f32.mrb[25].mxu1 }
 0x376   : > { %v1484_v15 = vadd.f32 %v3097_v2, %v1483_v61  ;;  %v2326_v56 = vpop.f32.mrb[26].mxu1 }
 0x377   : > { %v1495_v57 = vadd.f32 %v2326_v56, %v3097_v2  ;;  %v1486_v54 = vpop.f32.mrb[27].mxu1  ;;  %v1576_v1 = vmax.f32 %v1492_v36, 0.0 }
 0x378   : > { %v1487_v16 = vadd.f32 %v3097_v2, %v1486_v54  ;;  %v1574_v4 = vmax.f32 %v1484_v15, 0.0 }
 0x379   : > { %v1577_v58 = vmax.f32 %v1495_v57, 0.0 }
 0x37a   : > { %v1575_v59 = vmax.f32 %v1487_v16, 0.0 }
 0x37b   : > { %v1601_v23 = vpack.c.bf16 %v1577_v58, %v1576_v1 }
 0x37c   : > { %v1600_v14 = vpack.c.bf16 %v1575_v59, %v1574_v4  ;;  %v2329_v26 = vpop.f32.mrb[28].mxu1 }
 0x37d   : > { %v1508_v24 = vadd.f32 %v2329_v26, %v3097_v2  ;;  %v1499_v63 = vpop.f32.mrb[29].mxu1 }
 0x37e   : > { %v1500_v52 = vadd.f32 %v3097_v2, %v1499_v63  ;;  %v2330_v7 = vpop.f32.mrb[30].mxu1  ;;  %2365 = vmatprep.mubr.msk.bf16.mxu0 %vm1048_vm0, %v1600_v14 }
 0x37f   : > { %v1511_v20 = vadd.f32 %v2330_v7, %v3097_v2  ;;  %v1502_v62 = vpop.f32.mrb[31].mxu1  ;;  %2366 = vmatmul.mubr.msk.bf16.gmra.mrb[32].mxu0 %vm1048_vm0, %v1601_v23  ;;  %v1580_v3 = vmax.f32 %v1508_v24, 0.0 }
 0x380   : > { %v1503_v8 = vadd.f32 %v3097_v2, %v1502_v62  ;;  %v1578_v5 = vmax.f32 %v1500_v52, 0.0 }
 0x381   : > { %v1581_v0 = vmax.f32 %v1511_v20, 0.0 }
 0x382   : > { %v1579_v6 = vmax.f32 %v1503_v8, 0.0 }
 0x383   : > { %v1603_v38 = vpack.c.bf16 %v1581_v0, %v1580_v3  ;;  %v3160_v3 = vld [vmem:[%s3225_s8] ss:$0 sm:$0xff] }
 0x384   : > { %v1602_v10 = vpack.c.bf16 %v1579_v6, %v1578_v5  ;;  %v2333_v41 = vpop.f32.mrb[32].mxu1 }
 0x385   : > { %v1524_v37 = vadd.f32 %v2333_v41, %v3097_v2  ;;  %v1515_v11 = vpop.f32.mrb[33].mxu1 }
 0x386   : > { %v1516_v12 = vadd.f32 %v3097_v2, %v1515_v11  ;;  %v2334_v13 = vpop.f32.mrb[34].mxu1  ;;  %2369 = vmatprep.mubr.msk.bf16.mxu0 %vm1048_vm0, %v1602_v10 }
 0x387   : > { %v1527_v17 = vadd.f32 %v2334_v13, %v3097_v2  ;;  %v1518_v18 = vpop.f32.mrb[35].mxu1  ;;  %2370 = vmatmul.mubr.msk.bf16.gmra.mrb[36].mxu0 %vm1048_vm0, %v1603_v38  ;;  %v1584_v32 = vmax.f32 %v1524_v37, 0.0 }
 0x388   : > { %v1519_v19 = vadd.f32 %v3097_v2, %v1518_v18  ;;  %v1582_v35 = vmax.f32 %v1516_v12, 0.0 }
 0x389   : > { %v1585_v34 = vmax.f32 %v1527_v17, 0.0 }
 0x38a   : > { %v1583_v60 = vmax.f32 %v1519_v19, 0.0 }
 0x38b   : > { %v1605_v40 = vpack.c.bf16 %v1585_v34, %v1584_v32 }
 0x38c   : > { %v1604_v22 = vpack.c.bf16 %v1583_v60, %v1582_v35  ;;  %v2337_v28 = vpop.f32.mrb[36].mxu1 }
 0x38d   : > { %v1540_v9 = vadd.f32 %v2337_v28, %v3097_v2  ;;  %v1531_v30 = vpop.f32.mrb[37].mxu1 }
 0x38e   : > { %v1532_v31 = vadd.f32 %v3097_v2, %v1531_v30  ;;  %v2338_v39 = vpop.f32.mrb[38].mxu1  ;;  %2373 = vmatprep.mubr.msk.bf16.mxu0 %vm1048_vm0, %v1604_v22 }
 0x38f   : > { %v1588_v21 = vmax.f32 %v1540_v9, 0.0  ;;  %v1543_v55 = vadd.f32 %v2338_v39, %v3097_v2  ;;  %v1534_v25 = vpop.f32.mrb[39].mxu1  ;;  %2374 = vmatmul.mubr.msk.bf16.gmra.mrb[40].mxu0 %vm1048_vm0, %v1605_v40 }
 0x390   : > { %v1586_v42 = vmax.f32 %v1532_v31, 0.0  ;;  %v1535_v33 = vadd.f32 %v3097_v2, %v1534_v25 }
 0x391   : > { %v1589_v44 = vmax.f32 %v1543_v55, 0.0 }
 0x392   : > { %v1587_v46 = vmax.f32 %v1535_v33, 0.0 }
 0x393   : > { %v1607_v45 = vpack.c.bf16 %v1589_v44, %v1588_v21 }
 0x394   : > { %v1606_v43 = vpack.c.bf16 %v1587_v46, %v1586_v42  ;;  %v2341_v48 = vpop.f32.mrb[40].mxu1 }
 0x395   : > { %v1556_v47 = vadd.f32 %v2341_v48, %v3097_v2  ;;  %v1547_v49 = vpop.f32.mrb[41].mxu1 }
 0x396   : > { %v1548_v29 = vadd.f32 %v3097_v2, %v1547_v49  ;;  %v2342_v50 = vpop.f32.mrb[42].mxu1  ;;  %2377 = vmatprep.mubr.msk.bf16.mxu0 %vm1048_vm0, %v1606_v43 }
 0x397   : > { %v1592_v51 = vmax.f32 %v1556_v47, 0.0  ;;  %v1559_v53 = vadd.f32 %v2342_v50, %v3097_v2  ;;  %v1550_v27 = vpop.f32.mrb[43].mxu1  ;;  %2378 = vmatmul.mubr.msk.bf16.gmra.mrb[44].mxu0 %vm1048_vm0, %v1607_v45 }
 0x398   : > { %v1590_v36 = vmax.f32 %v1548_v29, 0.0  ;;  %v1551_v61 = vadd.f32 %v3097_v2, %v1550_v27 }
 0x399   : > { %v1593_v15 = vmax.f32 %v1559_v53, 0.0 }
 0x39a   : > { %v1591_v56 = vmax.f32 %v1551_v61, 0.0 }
 0x39b   : > { %v1609_v57 = vpack.c.bf16 %v1593_v15, %v1592_v51 }
 0x39c   : > { %v1608_v54 = vpack.c.bf16 %v1591_v56, %v1590_v36 }
 0x39e   : > { %2381 = vmatprep.mubr.msk.bf16.mxu0 %vm1048_vm0, %v1608_v54 }
 0x39f   : > { %2382 = vmatmul.mubr.msk.bf16.gmra.mrb[48].mxu0 %vm1048_vm0, %v1609_v57 }
 0x422   : > { %v2355_v16 = vpop.f32.mrb[20].mxu0 }
 0x423   : > { %v1739_v1 = vpop.f32.mrb[21].mxu0  ;;  %v1748_v0 = vadd.f32 %v2355_v16, %v3160_v3 }
 0x424   : > { %v2356_v58 = vpop.f32.mrb[22].mxu0  ;;  %v1740_v5 = vadd.f32 %v3160_v3, %v1739_v1 }
 0x425   : > { %v1742_v4 = vpop.f32.mrb[23].mxu0  ;;  %v1751_v38 = vadd.f32 %v2356_v58, %v3160_v3  ;;  %v1868_v13 = vmax.f32 %v1748_v0, 0.0 }
 0x426   : > { %v1743_v37 = vadd.f32 %v3160_v3, %v1742_v4  ;;  %v1866_v32 = vmax.f32 %v1740_v5, 0.0 }
 0x427   : > { %v1869_v60 = vmax.f32 %v1751_v38, 0.0 }
 0x428   : > { %v1867_v28 = vmax.f32 %v1743_v37, 0.0 }
 0x432   : > { %v2359_v59 = vpop.f32.mrb[24].mxu0 }
 0x433   : > { %v1755_v23 = vpop.f32.mrb[25].mxu0  ;;  %v1764_v31 = vadd.f32 %v2359_v59, %v3160_v3 }
 0x434   : > { %v2360_v14 = vpop.f32.mrb[26].mxu0  ;;  %v1756_v21 = vadd.f32 %v3160_v3, %v1755_v23 }
 0x435   : > { %v1758_v26 = vpop.f32.mrb[27].mxu0  ;;  %v1767_v42 = vadd.f32 %v2360_v14, %v3160_v3  ;;  %v1872_v48 = vmax.f32 %v1764_v31, 0.0 }
 0x436   : > { %v1759_v46 = vadd.f32 %v3160_v3, %v1758_v26  ;;  %v1870_v50 = vmax.f32 %v1756_v21, 0.0 }
 0x437   : > { %v1873_v27 = vmax.f32 %v1767_v42, 0.0 }
 0x438   : > { %v1871_v15 = vmax.f32 %v1759_v46, 0.0 }
 0x442   : > { %v2363_v24 = vpop.f32.mrb[28].mxu0 }
 0x443   : > { %v1771_v63 = vpop.f32.mrb[29].mxu0  ;;  %v1780_v54 = vadd.f32 %v2363_v24, %v3160_v3 }
 0x444   : > { %v2364_v52 = vpop.f32.mrb[30].mxu0  ;;  %v1772_v1 = vadd.f32 %v3160_v3, %v1771_v63 }
 0x445   : > { %v3147_v2 = vpop.f32.mrb[31].mxu0  ;;  %v1783_v59 = vadd.f32 %v2364_v52, %v3160_v3 }
 0x446   : > { %v1775_v26 = vadd.f32 %v3160_v3, %v3147_v2  ;;  %v1874_v63 = vmax.f32 %v1772_v1, 0.0 }
 0x447   : > { %v1877_v52 = vmax.f32 %v1783_v59, 0.0 }
 0x452   : > { %v3149_v7 = vpop.f32.mrb[32].mxu0 }
 0x453   : > { %v3151_v20 = vpop.f32.mrb[33].mxu0  ;;  %v1796_v2 = vadd.f32 %v3149_v7, %v3160_v3 }
 0x454   : > { %v3153_v62 = vpop.f32.mrb[34].mxu0 }
 0x455   : > { %v3155_v8 = vpop.f32.mrb[35].mxu0  ;;  %v1880_v7 = vmax.f32 %v1796_v2, 0.0  ;;  %v1962_v2 = vld [vmem:[%s3226_s9] sm:$0x7] }
 0x45a   : > { %v2371_v6 = vpop.f32.mrb[36].mxu0 }
 0x45b   : > { %v1812_v10 = vadd.f32 %v2371_v6, %v3160_v3  ;;  %v1803_v41 = vpop.f32.mrb[37].mxu0  ;;  %v1876_v6 = vmax.f32 %v1780_v54, 0.0 }
 0x45c   : > { %v1804_v11 = vadd.f32 %v3160_v3, %v1803_v41  ;;  %v2372_v12 = vpop.f32.mrb[38].mxu0 }
 0x45d   : > { %v1884_v17 = vmax.f32 %v1812_v10, 0.0  ;;  %v1815_v18 = vadd.f32 %v2372_v12, %v3160_v3  ;;  %v1806_v19 = vpop.f32.mrb[39].mxu0 }
 0x45e   : > { %v1882_v34 = vmax.f32 %v1804_v11, 0.0  ;;  %v1807_v35 = vadd.f32 %v3160_v3, %v1806_v19 }
 0x45f   : > { %v2462_v40 = vpack.i.bf16 %v1868_v13, %v1884_v17  ;;  %v1885_v22 = vmax.f32 %v1815_v18, 0.0  ;;  %v1875_v13 = vmax.f32 %v1775_v26, 0.0 }
 0x460   : > { %v2458_v9 = vpack.i.bf16 %v1866_v32, %v1882_v34  ;;  %v1883_v30 = vmax.f32 %v1807_v35, 0.0  ;;  %v1788_v32 = vadd.f32 %v3160_v3, %v3151_v20 }
 0x461   : > { %v2464_v39 = vpack.i.bf16 %v1869_v60, %v1885_v22  ;;  %v1799_v60 = vadd.f32 %v3153_v62, %v3160_v3 }
 0x462   : > { %v2460_v55 = vpack.i.bf16 %v1867_v28, %v1883_v30  ;;  %v2375_v25 = vpop.f32.mrb[40].mxu0  ;;  %2459 = vxpose.xlu0.b32.start [1/16] (narrow) %v2458_v9, 80  ;;  %v1791_v28 = vadd.f32 %v3160_v3, %v3155_v8  ;;  %v1878_v21 = vmax.f32 %v1788_v32, 0.0 }
 0x463   : > { %v1828_v33 = vadd.f32 %v2375_v25, %v3160_v3  ;;  %v1819_v44 = vpop.f32.mrb[41].mxu0  ;;  %v1881_v62 = vmax.f32 %v1799_v60, 0.0 }
 0x464   : > { %v1820_v45 = vadd.f32 %v3160_v3, %v1819_v44  ;;  %v2376_v43 = vpop.f32.mrb[42].mxu0  ;;  %v1879_v44 = vmax.f32 %v1791_v28, 0.0 }
 0x465   : > { %v1888_v47 = vmax.f32 %v1828_v33, 0.0  ;;  %v1831_v49 = vadd.f32 %v2376_v43, %v3160_v3  ;;  %v1822_v29 = vpop.f32.mrb[43].mxu0 }
 0x466   : > { %v1886_v51 = vmax.f32 %v1820_v45, 0.0  ;;  %v1823_v53 = vadd.f32 %v3160_v3, %v1822_v29  ;;  %2461 = vxpose.xlu0.b32.cont [2/16] (narrow) %v2460_v55, 80 }
 0x467   : > { %v2470_v36 = vpack.i.bf16 %v1872_v48, %v1888_v47  ;;  %v1889_v61 = vmax.f32 %v1831_v49, 0.0 }
 0x468   : > { %v2466_v56 = vpack.i.bf16 %v1870_v50, %v1886_v51  ;;  %v1887_v57 = vmax.f32 %v1823_v53, 0.0 }
 0x469   : > { %v2472_v16 = vpack.i.bf16 %v1873_v27, %v1889_v61 }
 0x46a   : > { %v2468_v58 = vpack.i.bf16 %v1871_v15, %v1887_v57  ;;  %v2379_v4 = vpop.f32.mrb[44].mxu0  ;;  %2463 = vxpose.xlu0.b32.cont [3/16] (narrow) %v2462_v40, 80 }
 0x46b   : > { %v1844_v23 = vadd.f32 %v2379_v4, %v3160_v3  ;;  %v1835_v14 = vpop.f32.mrb[45].mxu0 }
 0x46c   : > { %v1836_v0 = vadd.f32 %v3160_v3, %v1835_v14  ;;  %v2380_v5 = vpop.f32.mrb[46].mxu0 }
 0x46d   : > { %v1892_v38 = vmax.f32 %v1844_v23, 0.0  ;;  %v1847_v24 = vadd.f32 %v2380_v5, %v3160_v3  ;;  %v1838_v10 = vpop.f32.mrb[47].mxu0 }
 0x46e   : > { %v1890_v41 = vmax.f32 %v1836_v0, 0.0  ;;  %v1839_v37 = vadd.f32 %v3160_v3, %v1838_v10  ;;  %2465 = vxpose.xlu0.b32.cont [4/16] (narrow) %v2464_v39, 80 }
 0x46f   : > { %v2478_v11 = vpack.i.bf16 %v1876_v6, %v1892_v38  ;;  %v1893_v12 = vmax.f32 %v1847_v24, 0.0 }
 0x470   : > { %v2474_v17 = vpack.i.bf16 %v1874_v63, %v1890_v41  ;;  %v1891_v18 = vmax.f32 %v1839_v37, 0.0 }
 0x471   : > { %v2480_v19 = vpack.i.bf16 %v1877_v52, %v1893_v12 }
 0x472   : > { %v2476_v34 = vpack.i.bf16 %v1875_v13, %v1891_v18  ;;  %v2383_v35 = vpop.f32.mrb[48].mxu0  ;;  %2467 = vxpose.xlu0.b32.cont [5/16] (narrow) %v2466_v56, 80 }
 0x473   : > { %v1860_v40 = vadd.f32 %v2383_v35, %v3160_v3  ;;  %v1851_v22 = vpop.f32.mrb[49].mxu0  ;;  %v1978_v35 = vpop.permute.xlu1 %1977 }
 0x474   : > { %v1852_v9 = vadd.f32 %v3160_v3, %v1851_v22  ;;  %v2384_v30 = vpop.f32.mrb[50].mxu0 }
 0x475   : > { %v1896_v31 = vmax.f32 %v1860_v40, 0.0  ;;  %v1863_v39 = vadd.f32 %v2384_v30, %v3160_v3  ;;  %v1854_v20 = vpop.f32.mrb[51].mxu0 }
 0x476   : > { %v1894_v55 = vmax.f32 %v1852_v9, 0.0  ;;  %v1855_v25 = vadd.f32 %v3160_v3, %v1854_v20  ;;  %2469 = vxpose.xlu0.b32.cont [6/16] (narrow) %v2468_v58, 80 }
 0x477   : > { %v2486_v42 = vpack.i.bf16 %v1880_v7, %v1896_v31  ;;  %v1897_v33 = vmax.f32 %v1863_v39, 0.0 }
 0x478   : > { %v2482_v46 = vpack.i.bf16 %v1878_v21, %v1894_v55  ;;  %v1895_v45 = vmax.f32 %v1855_v25, 0.0 }
 0x479   : > { %v2488_v8 = vpack.i.bf16 %v1881_v62, %v1897_v33 }
 0x47a   : > { %v2484_v43 = vpack.i.bf16 %v1879_v44, %v1895_v45  ;;  %2471 = vxpose.xlu0.b32.cont [7/16] (narrow) %v2470_v36, 80 }
 0x47e   : > { %2473 = vxpose.xlu0.b32.cont [8/16] (narrow) %v2472_v16, 80 }
 0x482   : > { %2475 = vxpose.xlu0.b32.cont [9/16] (narrow) %v2474_v17, 80 }
 0x486   : > { %2477 = vxpose.xlu0.b32.cont [10/16] (narrow) %v2476_v34, 80  ;;  %v1963_v34 = vpack.c.bf16 %v1962_v2, %v1962_v2 }
 0x48a   : > { %2479 = vxpose.xlu0.b32.cont [11/16] (narrow) %v2478_v11, 80 }
 0x48e   : > { %2481 = vxpose.xlu0.b32.cont [12/16] (narrow) %v2480_v19, 80 }
 0x492   : > { %2483 = vxpose.xlu0.b32.cont [13/16] (narrow) %v2482_v46, 80 }
 0x496   : > { %2485 = vxpose.xlu0.b32.cont [14/16] (narrow) %v2484_v43, 80 }
 0x49a   : > { %2487 = vxpose.xlu0.b32.cont [15/16] (narrow) %v2486_v42, 80 }
 0x49e   : > { %2489 = vxpose.xlu0.b32.end [16/16] (narrow) %v2488_v8, 80 }
 0x4e2   : > { %v2490_v3 = vpop.trf.xlu0 }
 0x4e3   : > { %v2494_v48 = vunpack.i.h.bf16 %v2490_v3  ;;  %v2491_v47 = vunpack.i.l.bf16 %v2490_v3 }
 0x4e6   : > { %v2495_v49 = vpop.trf.xlu0 }
 0x4e7   : > { %v2499_v29 = vunpack.i.h.bf16 %v2495_v49  ;;  %v2496_v50 = vunpack.i.l.bf16 %v2495_v49 }
 0x4e9   : > { %v1965_v51 = vpack.c.bf16 %v2496_v50, %v2491_v47  ;;  %v1964_v53 = vpack.c.bf16 %v2499_v29, %v2494_v48 }
 0x4ea   : > { %v2500_v27 = vpop.trf.xlu0 }
 0x4eb   : > { %1983 = vmatprep.subr.bf16.mxu1 %v1965_v51  ;;  %v2504_v36 = vunpack.i.h.bf16 %v2500_v27  ;;  %v2501_v61 = vunpack.i.l.bf16 %v2500_v27 }
 0x4ec   : > { %1984 = vmatpush1.bf16.msra.mxu1 %v1964_v53 }
 0x4ee   : > { %v2505_v15 = vpop.trf.xlu0 }
 0x4ef   : > { %v2509_v56 = vunpack.i.h.bf16 %v2505_v15  ;;  %v2506_v57 = vunpack.i.l.bf16 %v2505_v15 }
 0x4f1   : > { %v1967_v54 = vpack.c.bf16 %v2506_v57, %v2501_v61  ;;  %v1966_v16 = vpack.c.bf16 %v2509_v56, %v2504_v36 }
 0x4f2   : > { %v2510_v1 = vpop.trf.xlu0 }
 0x4f3   : > { %1985 = vmatprep.subr.bf16.mxu1 %v1967_v54  ;;  %v2514_v58 = vunpack.i.h.bf16 %v2510_v1  ;;  %v2511_v4 = vunpack.i.l.bf16 %v2510_v1 }
 0x4f4   : > { %1986 = vmatpush1.bf16.msra.mxu1 %v1966_v16 }
 0x4f6   : > { %v2515_v59 = vpop.trf.xlu0 }
 0x4f7   : > { %v2519_v23 = vunpack.i.h.bf16 %v2515_v59  ;;  %v2516_v14 = vunpack.i.l.bf16 %v2515_v59 }
 0x4f9   : > { %v1969_v26 = vpack.c.bf16 %v2516_v14, %v2511_v4  ;;  %v1968_v0 = vpack.c.bf16 %v2519_v23, %v2514_v58 }
 0x4fa   : > { %v2520_v5 = vpop.trf.xlu0 }
 0x4fb   : > { %1987 = vmatprep.subr.bf16.mxu1 %v1969_v26  ;;  %v2524_v6 = vunpack.i.h.bf16 %v2520_v5  ;;  %v2521_v38 = vunpack.i.l.bf16 %v2520_v5 }
 0x4fc   : > { %1988 = vmatpush1.bf16.msra.mxu1 %v1968_v0 }
 0x4fe   : > { %v2525_v24 = vpop.trf.xlu0 }
 0x4ff   : > { %v2529_v10 = vunpack.i.h.bf16 %v2525_v24  ;;  %v2526_v63 = vunpack.i.l.bf16 %v2525_v24 }
 0x501   : > { %v1971_v41 = vpack.c.bf16 %v2526_v63, %v2521_v38  ;;  %v1970_v37 = vpack.c.bf16 %v2529_v10, %v2524_v6 }
 0x502   : > { %v2530_v52 = vpop.trf.xlu0 }
 0x503   : > { %1989 = vmatprep.subr.bf16.mxu1 %v1971_v41  ;;  %v2534_v11 = vunpack.i.h.bf16 %v2530_v52  ;;  %v2531_v12 = vunpack.i.l.bf16 %v2530_v52 }
 0x504   : > { %1990 = vmatpush1.bf16.msra.mxu1 %v1970_v37 }
 0x506   : > { %v2535_v13 = vpop.trf.xlu0 }
 0x507   : > { %v2539_v17 = vunpack.i.h.bf16 %v2535_v13  ;;  %v2536_v18 = vunpack.i.l.bf16 %v2535_v13 }
 0x509   : > { %v1972_v19 = vpack.c.bf16 %v2539_v17, %v2534_v11  ;;  %v1973_v32 = vpack.c.bf16 %v2536_v18, %v2531_v12 }
 0x50b   : > { %1991 = vmatprep.subr.bf16.mxu1 %v1973_v32 }
 0x50c   : > { %1992 = vmatpush1.bf16.msra.mxu1 %v1972_v19 }
 0x50f   : > { %2191 = vmatmul.mubr.msk.bf16.vlgmr.msra.gmra.mrb[44].mxu1 %vm1048_vm0, %v1963_v34 }
 0x5e2   : > { %v2017_v60 = vpop.f32.mrb[44].mxu1 }
 0x5e3   : > { %v2018_v40 = vadd.f32 %v2017_v60, %v1978_v35  ;;  %v2019_v22 = vpop.f32.mrb[45].mxu1 }
 0x5e4   : > { %v2020_v28 = vadd.f32 %v2019_v22, %v1978_v35  ;;  %v2021_v9 = vpop.f32.mrb[46].mxu1 }
 0x5e5   : > { %v2022_v30 = vpop.f32.mrb[47].mxu1 }
 0x5e6   : > { %v2026_v7 = vcombine.low %v2018_v40, %v2020_v28 }
 0x5e8   : > { %2028 = vst [vmem:[%s424_s16] sm:$0x77] %v2026_v7 }
 0x5e9 PF: > { %s21_s19 = sadd.s32 1, %s2577_s19   ;;  %s3229_s17 = smov %s2573_s18 }
 0x5ea   : > { %p18_p5 = scmp.ge.s32.totalorder %s21_s19, 4   ;;  %s3230_s18 = smov %s3232_s20 }
 0x5ec   :  { %20 = sbr.rel (!%p18_p5) target bundleno = 2 (0x2), region = 94 }

</bundles_post_ra>
